<compile_context>
chip_gen: v5e
topology: v5e:2x2
jax: 0.10.0
libtpu: 0.0.40
codegen_flags: <defaults>
</compile_context>

<pallas_src>
import functools
import math

import jax
import jax.numpy as jnp
from jax import lax
from jax.experimental import pallas as pl
from jax.experimental.pallas import tpu as pltpu

EPS = 1e-6        # `epsilon` global of the reference module (Marian LayerNorm eps)
NEG_INF = -1e30   # finite mask sentinel: keeps softmax well-defined for fully-masked rows


# ---------------- pure math helpers ------------------------------------------------------

def _layernorm(x, g, b):
    mu = jnp.mean(x, axis=-1, keepdims=True)
    var = jnp.mean((x - mu) ** 2, axis=-1, keepdims=True)
    return (x - mu) * lax.rsqrt(var + EPS) * g + b


def _silu(x):
    return x * (1.0 / (1.0 + jnp.exp(-x)))


# ---------------- Pallas kernel ----------------------------------------------------------

def _decoder_layer_kernel(num_heads, head_size,
                          ylen_ref, xlen_ref,                      # scalar prefetch (SMEM)
                          y_ref, ykv_ref, xe_ref,                  # activations (VMEM)
                          q0w, q0b, k0w, k0b, v0w, v0b, o0w, o0b, ln0g, ln0b,
                          q1w, q1b, k1w, k1b, v1w, v1b, o1w, o1b, ln1g, ln1b,
                          f1w, f1b, f2w, f2b, ln2g, ln2b,
                          out_ref,
                          k0s, v0s, k1s, v1s):                     # VMEM scratch (bf16 K/V)
    H, D = num_heads, head_size
    b = pl.program_id(0)
    qi = pl.program_id(1)

    tq = y_ref.shape[1]          # query-row tile
    T = ykv_ref.shape[1]         # full target length (self-attn keys)
    S = xe_ref.shape[1]          # source length (cross-attn keys)

    y_len = ylen_ref[b]
    x_len = xlen_ref[b]

    # ---- K/V projections hoisted: one full-E matmul each, once per batch element.
    @pl.when(qi == 0)
    def _fill_kv():
        ysrc = ykv_ref[0]                                           # (T, E) bf16
        xsrc = xe_ref[0]                                            # (S, E) bf16
        k0 = jnp.dot(ysrc, k0w[...], preferred_element_type=jnp.float32) + k0b[...]
        v0 = jnp.dot(ysrc, v0w[...], preferred_element_type=jnp.float32) + v0b[...]
        k1 = jnp.dot(xsrc, k1w[...], preferred_element_type=jnp.float32) + k1b[...]
        v1 = jnp.dot(xsrc, v1w[...], preferred_element_type=jnp.float32) + v1b[...]
        # Head split is layout-only (static lane slices), done once per batch element.
        for h in range(H):
            sl = slice(h * D, (h + 1) * D)
            k0s[h] = k0[:, sl].astype(jnp.bfloat16)
            v0s[h] = v0[:, sl].astype(jnp.bfloat16)
            k1s[h] = k1[:, sl].astype(jnp.bfloat16)
            v1s[h] = v1[:, sl].astype(jnp.bfloat16)

    # ---- additive mask biases (built once per tile, shared by all heads lazily)
    rows = qi * tq + lax.broadcasted_iota(jnp.int32, (tq, T), 0)
    cols_t = lax.broadcasted_iota(jnp.int32, (tq, T), 1)
    keep_self = jnp.logical_and(cols_t <= rows, cols_t < y_len)     # causal & padding
    bias_self = jnp.where(keep_self, 0.0, NEG_INF).astype(jnp.float32)
    cols_s = lax.broadcasted_iota(jnp.int32, (tq, S), 1)
    bias_cross = jnp.where(cols_s < x_len, 0.0, NEG_INF).astype(jnp.float32)

    def _attn(h_ln, ks, vs, bias, wq, bq, wo, bo):
        """h_ln (tq,E) f32; ks/vs (H,Tk,D) bf16; bias (tq,Tk) f32 -> (tq,E) f32."""
        # single full-E Q projection; 1/sqrt(D) pre-folded into wq/bq on the host
        q2d = jnp.dot(h_ln.astype(jnp.bfloat16), wq,
                      preferred_element_type=jnp.float32) + bq      # (tq, E) f32
        # layout-only head split -> (H, tq, D) bf16 (no matmuls, no activation copies)
        q = jnp.stack([q2d[:, h * D:(h + 1) * D] for h in range(H)],
                      axis=0).astype(jnp.bfloat16)
        s = jnp.einsum('hqd,hkd->hqk', q, ks,
                       preferred_element_type=jnp.float32)          # (H, tq, Tk) f32
        s = s + bias[None]
        m = jnp.max(s, axis=-1, keepdims=True)
        p = jnp.exp(s - m)
        l = jnp.sum(p, axis=-1, keepdims=True)
        o = jnp.einsum('hqk,hkd->hqd', p.astype(jnp.bfloat16), vs,
                       preferred_element_type=jnp.float32)          # (H, tq, D) f32
        o = o * pl.reciprocal(l, approx=True)                       # normalize after A@V
        # layout-only head merge -> (tq, E), then a single full-E output projection
        o2d = jnp.concatenate([o[h] for h in range(H)], axis=-1).astype(jnp.bfloat16)
        return jnp.dot(o2d, wo, preferred_element_type=jnp.float32) + bo

    y = y_ref[0]                                                     # (tq, E) f32

    # --- block 0: causal self-attention (K,V from raw y; Q from LN(y), as in reference)
    h = _layernorm(y, ln0g[...], ln0b[...])
    h = _attn(h, k0s[...], v0s[...], bias_self, q0w[...], q0b[...], o0w[...], o0b[...])
    y = h + y                                                        # dropout == identity

    # --- block 1: cross-attention over encoder states
    h = _layernorm(y, ln1g[...], ln1b[...])
    h = _attn(h, k1s[...], v1s[...], bias_cross, q1w[...], q1b[...], o1w[...], o1b[...])
    y = h + y

    # --- block 2: position-wise FFN with SiLU
    h = _layernorm(y, ln2g[...], ln2b[...])
    u = jnp.dot(h.astype(jnp.bfloat16), f1w[...],
                preferred_element_type=jnp.float32) + f1b[...]
    u = _silu(u)
    h = jnp.dot(u.astype(jnp.bfloat16), f2w[...],
                preferred_element_type=jnp.float32) + f2b[...]
    out_ref[0] = h + y
    # TODO(synk): dropout is a no-op here (inference); stochastic dropout needs pltpu.prng_*.


# ---------------- wrapper ----------------------------------------------------------------

def _vmem_limit_bytes():
    # ~96 MiB on v5e/v6e (128 MiB physical VMEM), ~48 MiB on v7x (64 MiB physical VMEM).
    try:
        cap = int(pltpu.get_tpu_info().vmem_capacity_bytes)
        if cap <= 0:
            cap = 64 * 1024 * 1024
    except Exception:
        cap = 64 * 1024 * 1024
    return min(cap * 3 // 4, 100 * 1024 * 1024)


def run_decoder_layer(y, x_e, y_len, x_len, params, num_heads, tq):
    B, T, E = y.shape
    S = x_e.shape[1]
    H = num_heads
    D = E // H
    assert E % H == 0 and T % tq == 0

    (q0w, q0b, k0w, k0b, v0w, v0b, o0w, o0b, ln0g, ln0b,
     q1w, q1b, k1w, k1b, v1w, v1b, o1w, o1b, ln1g, ln1b,
     f1w, f1b, f2w, f2b, ln2g, ln2b) = params
    Fdim = f1w.shape[1]

    scale = 1.0 / math.sqrt(D)      # folded into Q weights/biases: no in-kernel scaling
    bf = lambda w: w.astype(jnp.bfloat16)

    weights = [
        bf(q0w * scale), (q0b * scale).reshape(1, E),
        bf(k0w), k0b.reshape(1, E), bf(v0w), v0b.reshape(1, E),
        bf(o0w), o0b.reshape(1, E),
        ln0g.reshape(1, E), ln0b.reshape(1, E),
        bf(q1w * scale), (q1b * scale).reshape(1, E),
        bf(k1w), k1b.reshape(1, E), bf(v1w), v1b.reshape(1, E),
        bf(o1w), o1b.reshape(1, E),
        ln1g.reshape(1, E), ln1b.reshape(1, E),
        bf(f1w), f1b.reshape(1, Fdim), bf(f2w), f2b.reshape(1, E),
        ln2g.reshape(1, E), ln2b.reshape(1, E),
    ]

    # K/V source activations are only ever MXU operands -> ship them as bf16
    y_kv = y.astype(jnp.bfloat16)
    xe_b = x_e.astype(jnp.bfloat16)

    def w_spec(w):
        zeros = (0,) * w.ndim
        return pl.BlockSpec(w.shape, lambda b, qi, yl, xl, _z=zeros: _z)

    in_specs = [
        pl.BlockSpec((1, tq, E), lambda b, qi, yl, xl: (b, qi, 0)),   # y query-row tile f32
        pl.BlockSpec((1, T, E), lambda b, qi, yl, xl: (b, 0, 0)),     # y K/V source (bf16)
        pl.BlockSpec((1, S, E), lambda b, qi, yl, xl: (b, 0, 0)),     # encoder states (bf16)
    ] + [w_spec(w) for w in weights]

    out_specs = pl.BlockSpec((1, tq, E), lambda b, qi, yl, xl: (b, qi, 0))

    kernel = functools.partial(_decoder_layer_kernel, H, D)

    return pl.pallas_call(
        kernel,
        out_shape=jax.ShapeDtypeStruct((B, T, E), jnp.float32),
        grid_spec=pltpu.PrefetchScalarGridSpec(
            num_scalar_prefetch=2,                   # y_len, x_len -> SMEM
            grid=(B, T // tq),                       # (batch, query-row tile)
            in_specs=in_specs,
            out_specs=out_specs,
            scratch_shapes=[
                pltpu.VMEM((H, T, D), jnp.bfloat16),   # self-attn K
                pltpu.VMEM((H, T, D), jnp.bfloat16),   # self-attn V
                pltpu.VMEM((H, S, D), jnp.bfloat16),   # cross-attn K
                pltpu.VMEM((H, S, D), jnp.bfloat16),   # cross-attn V
            ]),
        compiler_params=pltpu.CompilerParams(
            # tile axis must stay "arbitrary": K/V scratch is filled at qi == 0 and reused.
            dimension_semantics=("parallel", "arbitrary"),
            vmem_limit_bytes=_vmem_limit_bytes()),
    )(y_len.astype(jnp.int32), x_len.astype(jnp.int32), y, y_kv, xe_b, *weights)


# ---------------- deterministic synthetic parameters --------------------------------------

def init_params(key, E, F):
    def lin(k, din, dout, scale=0.05):
        kw, kb = jax.random.split(k)
        w = scale * jax.random.normal(kw, (din, dout), jnp.float32)   # (in, out) layout
        b = scale * jax.random.normal(kb, (dout,), jnp.float32)
        return w, b

    def ln(k, d):
        kg, kb = jax.random.split(k)
        g = 1.0 + 0.05 * jax.random.normal(kg, (d,), jnp.float32)
        b = 0.05 * jax.random.normal(kb, (d,), jnp.float32)
        return g, b

    ks = jax.random.split(key, 13)
    q0 = lin(ks[0], E, E); k0 = lin(ks[1], E, E); v0 = lin(ks[2], E, E); o0 = lin(ks[3], E, E)
    ln0 = ln(ks[4], E)
    q1 = lin(ks[5], E, E); k1 = lin(ks[6], E, E); v1 = lin(ks[7], E, E); o1 = lin(ks[8], E, E)
    ln1 = ln(ks[9], E)
    f1 = lin(ks[10], E, F); f2 = lin(ks[11], F, E)
    ln2 = ln(ks[12], E)
    return [*q0, *k0, *v0, *o0, *ln0,
            *q1, *k1, *v1, *o1, *ln1,
            *f1, *f2, *ln2]


# ---------------- pure-JAX f32 reference (correctness check) ------------------------------

def _ref_mha(q_in, kv_in, keep, wq, bq, wk, bk, wv, bv, wo, bo, H):
    Tq, E = q_in.shape
    Tk = kv_in.shape[0]
    D = E // H
    q = (q_in @ wq + bq).reshape(Tq, H, D).transpose(1, 0, 2) / math.sqrt(D)
    k = (kv_in @ wk + bk).reshape(Tk, H, D).transpose(1, 0, 2)
    v = (kv_in @ wv + bv).reshape(Tk, H, D).transpose(1, 0, 2)
    s = jnp.einsum('hqd,hkd->hqk', q, k)
    s = jnp.where(keep[None], s, NEG_INF)
    p = jax.nn.softmax(s, axis=-1)
    o = jnp.einsum('hqk,hkd->hqd', p, v)
    o = o.transpose(1, 0, 2).reshape(Tq, E)
    return o @ wo + bo


def reference(y, x_e, y_len, x_len, params, num_heads):
    (q0w, q0b, k0w, k0b, v0w, v0b, o0w, o0b, ln0g, ln0b,
     q1w, q1b, k1w, k1b, v1w, v1b, o1w, o1b, ln1g, ln1b,
     f1w, f1b, f2w, f2b, ln2g, ln2b) = params
    B, T, E = y.shape
    S = x_e.shape[1]

    def single(y1, xe1, yl, xl):
        rows = jnp.arange(T)[:, None]
        cols_t = jnp.arange(T)[None, :]
        keep_self = (cols_t <= rows) & (cols_t < yl)
        keep_cross = jnp.broadcast_to(jnp.arange(S)[None, :] < xl, (T, S))

        h = _layernorm(y1, ln0g, ln0b)
        h = _ref_mha(h, y1, keep_self, q0w, q0b, k0w, k0b, v0w, v0b, o0w, o0b, num_heads)
        y1 = h + y1
        h = _layernorm(y1, ln1g, ln1b)
        h = _ref_mha(h, xe1, keep_cross, q1w, q1b, k1w, k1b, v1w, v1b, o1w, o1b, num_heads)
        y1 = h + y1
        h = _layernorm(y1, ln2g, ln2b)
        h = _silu(h @ f1w + f1b)
        h = h @ f2w + f2b
        return h + y1

    return jax.vmap(single)(y, x_e, y_len, x_len)


# ---------------- main ---------------------------------------------------------------------

if __name__ == "__main__":
    # batch, tgt len, src len, embed, ffn, heads, query-row tile
    B, T, S, E, F, H, TQ = 2, 16, 16, 32, 64, 4, 8

    key = jax.random.PRNGKey(0)
    k_y, k_x, k_p = jax.random.split(key, 3)
    y = jax.random.normal(k_y, (B, T, E), jnp.float32)
    x_e = jax.random.normal(k_x, (B, S, E), jnp.float32)
    # padding expressed as per-example valid lengths (replaces dense float masks)
    y_len = jnp.array([T, T - 3], jnp.int32)
    x_len = jnp.array([S, S - 2], jnp.int32)

    params = init_params(k_p, E, F)

    out = run_decoder_layer(y, x_e, y_len, x_len, params, H, tq=TQ)
    out = jax.block_until_ready(out)

    ref = reference(y, x_e, y_len, x_len, params, H)
    max_err = float(jnp.max(jnp.abs(out - ref)))
    assert bool(jnp.all(jnp.isfinite(out))), "non-finite output"
    # bf16 MXU operands in the kernel vs f32 reference -> loose tolerance
    assert jnp.allclose(out, ref, atol=5e-2, rtol=5e-2), f"max abs err = {max_err}"

    print("KERNEL_OK")
</pallas_src>

<mosaic_0001>
module attributes {stable_mosaic.version = 11 : i64} {
  func.func @_decoder_layer_kernel(%arg0: i32, %arg1: i32, %arg2: memref<2xi32, #tpu.memory_space<smem>>, %arg3: memref<2xi32, #tpu.memory_space<smem>>, %arg4: memref<1x8x32xf32, #tpu.memory_space<vmem>>, %arg5: memref<1x16x32xbf16, #tpu.memory_space<vmem>>, %arg6: memref<1x16x32xbf16, #tpu.memory_space<vmem>>, %arg7: memref<32x32xbf16, #tpu.memory_space<vmem>>, %arg8: memref<1x32xf32, #tpu.memory_space<vmem>>, %arg9: memref<32x32xbf16, #tpu.memory_space<vmem>>, %arg10: memref<1x32xf32, #tpu.memory_space<vmem>>, %arg11: memref<32x32xbf16, #tpu.memory_space<vmem>>, %arg12: memref<1x32xf32, #tpu.memory_space<vmem>>, %arg13: memref<32x32xbf16, #tpu.memory_space<vmem>>, %arg14: memref<1x32xf32, #tpu.memory_space<vmem>>, %arg15: memref<1x32xf32, #tpu.memory_space<vmem>>, %arg16: memref<1x32xf32, #tpu.memory_space<vmem>>, %arg17: memref<32x32xbf16, #tpu.memory_space<vmem>>, %arg18: memref<1x32xf32, #tpu.memory_space<vmem>>, %arg19: memref<32x32xbf16, #tpu.memory_space<vmem>>, %arg20: memref<1x32xf32, #tpu.memory_space<vmem>>, %arg21: memref<32x32xbf16, #tpu.memory_space<vmem>>, %arg22: memref<1x32xf32, #tpu.memory_space<vmem>>, %arg23: memref<32x32xbf16, #tpu.memory_space<vmem>>, %arg24: memref<1x32xf32, #tpu.memory_space<vmem>>, %arg25: memref<1x32xf32, #tpu.memory_space<vmem>>, %arg26: memref<1x32xf32, #tpu.memory_space<vmem>>, %arg27: memref<32x64xbf16, #tpu.memory_space<vmem>>, %arg28: memref<1x64xf32, #tpu.memory_space<vmem>>, %arg29: memref<64x32xbf16, #tpu.memory_space<vmem>>, %arg30: memref<1x32xf32, #tpu.memory_space<vmem>>, %arg31: memref<1x32xf32, #tpu.memory_space<vmem>>, %arg32: memref<1x32xf32, #tpu.memory_space<vmem>>, %arg33: memref<1x8x32xf32, #tpu.memory_space<vmem>>, %arg34: memref<4x16x8xbf16, #tpu.memory_space<vmem>>, %arg35: memref<4x16x8xbf16, #tpu.memory_space<vmem>>, %arg36: memref<4x16x8xbf16, #tpu.memory_space<vmem>>, %arg37: memref<4x16x8xbf16, #tpu.memory_space<vmem>>) attributes {dimension_semantics = [#tpu.dimension_semantics<parallel>, #tpu.dimension_semantics<arbitrary>], iteration_bounds = array<i64: 2, 2>, scalar_prefetch = 2 : i64, scratch_operands = 4 : i64, tpu.core_type = #tpu.core_type<tc>, window_params = [{transform_indices = @transform_0, window_bounds = array<i64: 1, 8, 32>}, {transform_indices = @transform_1, window_bounds = array<i64: 1, 16, 32>}, {transform_indices = @transform_2, window_bounds = array<i64: 1, 16, 32>}, {pipeline_mode = #tpu.pipeline_mode<synchronous>, transform_indices = @transform_3, window_bounds = array<i64: 32, 32>}, {pipeline_mode = #tpu.pipeline_mode<synchronous>, transform_indices = @transform_4, window_bounds = array<i64: 1, 32>}, {pipeline_mode = #tpu.pipeline_mode<synchronous>, transform_indices = @transform_5, window_bounds = array<i64: 32, 32>}, {pipeline_mode = #tpu.pipeline_mode<synchronous>, transform_indices = @transform_6, window_bounds = array<i64: 1, 32>}, {pipeline_mode = #tpu.pipeline_mode<synchronous>, transform_indices = @transform_7, window_bounds = array<i64: 32, 32>}, {pipeline_mode = #tpu.pipeline_mode<synchronous>, transform_indices = @transform_8, window_bounds = array<i64: 1, 32>}, {pipeline_mode = #tpu.pipeline_mode<synchronous>, transform_indices = @transform_9, window_bounds = array<i64: 32, 32>}, {pipeline_mode = #tpu.pipeline_mode<synchronous>, transform_indices = @transform_10, window_bounds = array<i64: 1, 32>}, {pipeline_mode = #tpu.pipeline_mode<synchronous>, transform_indices = @transform_11, window_bounds = array<i64: 1, 32>}, {pipeline_mode = #tpu.pipeline_mode<synchronous>, transform_indices = @transform_12, window_bounds = array<i64: 1, 32>}, {pipeline_mode = #tpu.pipeline_mode<synchronous>, transform_indices = @transform_13, window_bounds = array<i64: 32, 32>}, {pipeline_mode = #tpu.pipeline_mode<synchronous>, transform_indices = @transform_14, window_bounds = array<i64: 1, 32>}, {pipeline_mode = #tpu.pipeline_mode<synchronous>, transform_indices = @transform_15, window_bounds = array<i64: 32, 32>}, {pipeline_mode = #tpu.pipeline_mode<synchronous>, transform_indices = @transform_16, window_bounds = array<i64: 1, 32>}, {pipeline_mode = #tpu.pipeline_mode<synchronous>, transform_indices = @transform_17, window_bounds = array<i64: 32, 32>}, {pipeline_mode = #tpu.pipeline_mode<synchronous>, transform_indices = @transform_18, window_bounds = array<i64: 1, 32>}, {pipeline_mode = #tpu.pipeline_mode<synchronous>, transform_indices = @transform_19, window_bounds = array<i64: 32, 32>}, {pipeline_mode = #tpu.pipeline_mode<synchronous>, transform_indices = @transform_20, window_bounds = array<i64: 1, 32>}, {pipeline_mode = #tpu.pipeline_mode<synchronous>, transform_indices = @transform_21, window_bounds = array<i64: 1, 32>}, {pipeline_mode = #tpu.pipeline_mode<synchronous>, transform_indices = @transform_22, window_bounds = array<i64: 1, 32>}, {pipeline_mode = #tpu.pipeline_mode<synchronous>, transform_indices = @transform_23, window_bounds = array<i64: 32, 64>}, {pipeline_mode = #tpu.pipeline_mode<synchronous>, transform_indices = @transform_24, window_bounds = array<i64: 1, 64>}, {pipeline_mode = #tpu.pipeline_mode<synchronous>, transform_indices = @transform_25, window_bounds = array<i64: 64, 32>}, {pipeline_mode = #tpu.pipeline_mode<synchronous>, transform_indices = @transform_26, window_bounds = array<i64: 1, 32>}, {pipeline_mode = #tpu.pipeline_mode<synchronous>, transform_indices = @transform_27, window_bounds = array<i64: 1, 32>}, {pipeline_mode = #tpu.pipeline_mode<synchronous>, transform_indices = @transform_28, window_bounds = array<i64: 1, 32>}, {transform_indices = @transform_29, window_bounds = array<i64: 1, 8, 32>}]} {
    %0 = arith.index_cast %arg0 : i32 to index
    %1 = memref.load %arg2[%0] : memref<2xi32, #tpu.memory_space<smem>>
    %2 = arith.index_cast %arg0 : i32 to index
    %3 = memref.load %arg3[%2] : memref<2xi32, #tpu.memory_space<smem>>
    %c0_i32 = arith.constant 0 : i32
    %4 = arith.cmpi eq, %arg1, %c0_i32 : i32
    %5 = arith.extui %4 : i1 to i32
    %c0_i32_0 = arith.constant 0 : i32
    %6 = arith.cmpi ne, %5, %c0_i32_0 : i32
    scf.if %6 {
      %c0_89 = arith.constant 0 : index
      %c0_90 = arith.constant 0 : index
      %c0_91 = arith.constant 0 : index
      %223 = vector.load %arg5[%c0_89, %c0_90, %c0_91] : memref<1x16x32xbf16, #tpu.memory_space<vmem>>, vector<1x16x32xbf16>
      %224 = vector.shape_cast %223 : vector<1x16x32xbf16> to vector<16x32xbf16>
      %c0_92 = arith.constant 0 : index
      %c0_93 = arith.constant 0 : index
      %c0_94 = arith.constant 0 : index
      %225 = vector.load %arg6[%c0_92, %c0_93, %c0_94] : memref<1x16x32xbf16, #tpu.memory_space<vmem>>, vector<1x16x32xbf16>
      %226 = vector.shape_cast %225 : vector<1x16x32xbf16> to vector<16x32xbf16>
      %c0_95 = arith.constant 0 : index
      %c0_96 = arith.constant 0 : index
      %227 = vector.load %arg9[%c0_95, %c0_96] : memref<32x32xbf16, #tpu.memory_space<vmem>>, vector<32x32xbf16>
      %cst_97 = arith.constant dense<0.000000e+00> : vector<16x32xf32>
      %228 = tpu.matmul %224, %227, %cst_97 {dimension_numbers = #tpu.dot_dimension_numbers<[1], [0], [0], [1], [0, 0, 1, 1], [], []>} : vector<16x32xbf16>, vector<32x32xbf16>, vector<16x32xf32> -> vector<16x32xf32>
      %c0_98 = arith.constant 0 : index
      %c0_99 = arith.constant 0 : index
      %229 = vector.load %arg10[%c0_98, %c0_99] : memref<1x32xf32, #tpu.memory_space<vmem>>, vector<1x32xf32>
      %230 = vector.broadcast %229 : vector<1x32xf32> to vector<16x32xf32>
      %231 = arith.addf %228, %230 : vector<16x32xf32>
      %c0_100 = arith.constant 0 : index
      %c0_101 = arith.constant 0 : index
      %232 = vector.load %arg11[%c0_100, %c0_101] : memref<32x32xbf16, #tpu.memory_space<vmem>>, vector<32x32xbf16>
      %cst_102 = arith.constant dense<0.000000e+00> : vector<16x32xf32>
      %233 = tpu.matmul %224, %232, %cst_102 {dimension_numbers = #tpu.dot_dimension_numbers<[1], [0], [0], [1], [0, 0, 1, 1], [], []>} : vector<16x32xbf16>, vector<32x32xbf16>, vector<16x32xf32> -> vector<16x32xf32>
      %c0_103 = arith.constant 0 : index
      %c0_104 = arith.constant 0 : index
      %234 = vector.load %arg12[%c0_103, %c0_104] : memref<1x32xf32, #tpu.memory_space<vmem>>, vector<1x32xf32>
      %235 = vector.broadcast %234 : vector<1x32xf32> to vector<16x32xf32>
      %236 = arith.addf %233, %235 : vector<16x32xf32>
      %c0_105 = arith.constant 0 : index
      %c0_106 = arith.constant 0 : index
      %237 = vector.load %arg19[%c0_105, %c0_106] : memref<32x32xbf16, #tpu.memory_space<vmem>>, vector<32x32xbf16>
      %cst_107 = arith.constant dense<0.000000e+00> : vector<16x32xf32>
      %238 = tpu.matmul %226, %237, %cst_107 {dimension_numbers = #tpu.dot_dimension_numbers<[1], [0], [0], [1], [0, 0, 1, 1], [], []>} : vector<16x32xbf16>, vector<32x32xbf16>, vector<16x32xf32> -> vector<16x32xf32>
      %c0_108 = arith.constant 0 : index
      %c0_109 = arith.constant 0 : index
      %239 = vector.load %arg20[%c0_108, %c0_109] : memref<1x32xf32, #tpu.memory_space<vmem>>, vector<1x32xf32>
      %240 = vector.broadcast %239 : vector<1x32xf32> to vector<16x32xf32>
      %241 = arith.addf %238, %240 : vector<16x32xf32>
      %c0_110 = arith.constant 0 : index
      %c0_111 = arith.constant 0 : index
      %242 = vector.load %arg21[%c0_110, %c0_111] : memref<32x32xbf16, #tpu.memory_space<vmem>>, vector<32x32xbf16>
      %cst_112 = arith.constant dense<0.000000e+00> : vector<16x32xf32>
      %243 = tpu.matmul %226, %242, %cst_112 {dimension_numbers = #tpu.dot_dimension_numbers<[1], [0], [0], [1], [0, 0, 1, 1], [], []>} : vector<16x32xbf16>, vector<32x32xbf16>, vector<16x32xf32> -> vector<16x32xf32>
      %c0_113 = arith.constant 0 : index
      %c0_114 = arith.constant 0 : index
      %244 = vector.load %arg22[%c0_113, %c0_114] : memref<1x32xf32, #tpu.memory_space<vmem>>, vector<1x32xf32>
      %245 = vector.broadcast %244 : vector<1x32xf32> to vector<16x32xf32>
      %246 = arith.addf %243, %245 : vector<16x32xf32>
      %247 = vector.extract_strided_slice %231 {offsets = [0, 0], sizes = [16, 8], strides = [1, 1]} : vector<16x32xf32> to vector<16x8xf32>
      %248 = arith.truncf %247 : vector<16x8xf32> to vector<16x8xbf16>
      %c0_115 = arith.constant 0 : index
      %c0_116 = arith.constant 0 : index
      %c0_117 = arith.constant 0 : index
      %249 = vector.load %arg34[%c0_115, %c0_116, %c0_117] : memref<4x16x8xbf16, #tpu.memory_space<vmem>>, vector<1x16x8xbf16>
      %250 = vector.shape_cast %249 : vector<1x16x8xbf16> to vector<16x8xbf16>
      %251 = vector.shape_cast %248 : vector<16x8xbf16> to vector<1x16x8xbf16>
      tpu.vector_store %arg34[%c0_115, %c0_116, %c0_117], %251 {strides = array<i32>} : memref<4x16x8xbf16, #tpu.memory_space<vmem>>, vector<1x16x8xbf16>,
      %252 = vector.extract_strided_slice %236 {offsets = [0, 0], sizes = [16, 8], strides = [1, 1]} : vector<16x32xf32> to vector<16x8xf32>
      %253 = arith.truncf %252 : vector<16x8xf32> to vector<16x8xbf16>
      %c0_118 = arith.constant 0 : index
      %c0_119 = arith.constant 0 : index
      %c0_120 = arith.constant 0 : index
      %254 = vector.load %arg35[%c0_118, %c0_119, %c0_120] : memref<4x16x8xbf16, #tpu.memory_space<vmem>>, vector<1x16x8xbf16>
      %255 = vector.shape_cast %254 : vector<1x16x8xbf16> to vector<16x8xbf16>
      %256 = vector.shape_cast %253 : vector<16x8xbf16> to vector<1x16x8xbf16>
      tpu.vector_store %arg35[%c0_118, %c0_119, %c0_120], %256 {strides = array<i32>} : memref<4x16x8xbf16, #tpu.memory_space<vmem>>, vector<1x16x8xbf16>,
      %257 = vector.extract_strided_slice %241 {offsets = [0, 0], sizes = [16, 8], strides = [1, 1]} : vector<16x32xf32> to vector<16x8xf32>
      %258 = arith.truncf %257 : vector<16x8xf32> to vector<16x8xbf16>
      %c0_121 = arith.constant 0 : index
      %c0_122 = arith.constant 0 : index
      %c0_123 = arith.constant 0 : index
      %259 = vector.load %arg36[%c0_121, %c0_122, %c0_123] : memref<4x16x8xbf16, #tpu.memory_space<vmem>>, vector<1x16x8xbf16>
      %260 = vector.shape_cast %259 : vector<1x16x8xbf16> to vector<16x8xbf16>
      %261 = vector.shape_cast %258 : vector<16x8xbf16> to vector<1x16x8xbf16>
      tpu.vector_store %arg36[%c0_121, %c0_122, %c0_123], %261 {strides = array<i32>} : memref<4x16x8xbf16, #tpu.memory_space<vmem>>, vector<1x16x8xbf16>,
      %262 = vector.extract_strided_slice %246 {offsets = [0, 0], sizes = [16, 8], strides = [1, 1]} : vector<16x32xf32> to vector<16x8xf32>
      %263 = arith.truncf %262 : vector<16x8xf32> to vector<16x8xbf16>
      %c0_124 = arith.constant 0 : index
      %c0_125 = arith.constant 0 : index
      %c0_126 = arith.constant 0 : index
      %264 = vector.load %arg37[%c0_124, %c0_125, %c0_126] : memref<4x16x8xbf16, #tpu.memory_space<vmem>>, vector<1x16x8xbf16>
      %265 = vector.shape_cast %264 : vector<1x16x8xbf16> to vector<16x8xbf16>
      %266 = vector.shape_cast %263 : vector<16x8xbf16> to vector<1x16x8xbf16>
      tpu.vector_store %arg37[%c0_124, %c0_125, %c0_126], %266 {strides = array<i32>} : memref<4x16x8xbf16, #tpu.memory_space<vmem>>, vector<1x16x8xbf16>,
      %267 = vector.extract_strided_slice %231 {offsets = [0, 8], sizes = [16, 8], strides = [1, 1]} : vector<16x32xf32> to vector<16x8xf32>
      %268 = arith.truncf %267 : vector<16x8xf32> to vector<16x8xbf16>
      %c1 = arith.constant 1 : index
      %c0_127 = arith.constant 0 : index
      %c0_128 = arith.constant 0 : index
      %269 = vector.load %arg34[%c1, %c0_127, %c0_128] : memref<4x16x8xbf16, #tpu.memory_space<vmem>>, vector<1x16x8xbf16>
      %270 = vector.shape_cast %269 : vector<1x16x8xbf16> to vector<16x8xbf16>
      %271 = vector.shape_cast %268 : vector<16x8xbf16> to vector<1x16x8xbf16>
      tpu.vector_store %arg34[%c1, %c0_127, %c0_128], %271 {strides = array<i32>} : memref<4x16x8xbf16, #tpu.memory_space<vmem>>, vector<1x16x8xbf16>,
      %272 = vector.extract_strided_slice %236 {offsets = [0, 8], sizes = [16, 8], strides = [1, 1]} : vector<16x32xf32> to vector<16x8xf32>
      %273 = arith.truncf %272 : vector<16x8xf32> to vector<16x8xbf16>
      %c1_129 = arith.constant 1 : index
      %c0_130 = arith.constant 0 : index
      %c0_131 = arith.constant 0 : index
      %274 = vector.load %arg35[%c1_129, %c0_130, %c0_131] : memref<4x16x8xbf16, #tpu.memory_space<vmem>>, vector<1x16x8xbf16>
      %275 = vector.shape_cast %274 : vector<1x16x8xbf16> to vector<16x8xbf16>
      %276 = vector.shape_cast %273 : vector<16x8xbf16> to vector<1x16x8xbf16>
      tpu.vector_store %arg35[%c1_129, %c0_130, %c0_131], %276 {strides = array<i32>} : memref<4x16x8xbf16, #tpu.memory_space<vmem>>, vector<1x16x8xbf16>,
      %277 = vector.extract_strided_slice %241 {offsets = [0, 8], sizes = [16, 8], strides = [1, 1]} : vector<16x32xf32> to vector<16x8xf32>
      %278 = arith.truncf %277 : vector<16x8xf32> to vector<16x8xbf16>
      %c1_132 = arith.constant 1 : index
      %c0_133 = arith.constant 0 : index
      %c0_134 = arith.constant 0 : index
      %279 = vector.load %arg36[%c1_132, %c0_133, %c0_134] : memref<4x16x8xbf16, #tpu.memory_space<vmem>>, vector<1x16x8xbf16>
      %280 = vector.shape_cast %279 : vector<1x16x8xbf16> to vector<16x8xbf16>
      %281 = vector.shape_cast %278 : vector<16x8xbf16> to vector<1x16x8xbf16>
      tpu.vector_store %arg36[%c1_132, %c0_133, %c0_134], %281 {strides = array<i32>} : memref<4x16x8xbf16, #tpu.memory_space<vmem>>, vector<1x16x8xbf16>,
      %282 = vector.extract_strided_slice %246 {offsets = [0, 8], sizes = [16, 8], strides = [1, 1]} : vector<16x32xf32> to vector<16x8xf32>
      %283 = arith.truncf %282 : vector<16x8xf32> to vector<16x8xbf16>
      %c1_135 = arith.constant 1 : index
      %c0_136 = arith.constant 0 : index
      %c0_137 = arith.constant 0 : index
      %284 = vector.load %arg37[%c1_135, %c0_136, %c0_137] : memref<4x16x8xbf16, #tpu.memory_space<vmem>>, vector<1x16x8xbf16>
      %285 = vector.shape_cast %284 : vector<1x16x8xbf16> to vector<16x8xbf16>
      %286 = vector.shape_cast %283 : vector<16x8xbf16> to vector<1x16x8xbf16>
      tpu.vector_store %arg37[%c1_135, %c0_136, %c0_137], %286 {strides = array<i32>} : memref<4x16x8xbf16, #tpu.memory_space<vmem>>, vector<1x16x8xbf16>,
      %287 = vector.extract_strided_slice %231 {offsets = [0, 16], sizes = [16, 8], strides = [1, 1]} : vector<16x32xf32> to vector<16x8xf32>
      %288 = arith.truncf %287 : vector<16x8xf32> to vector<16x8xbf16>
      %c2 = arith.constant 2 : index
      %c0_138 = arith.constant 0 : index
      %c0_139 = arith.constant 0 : index
      %289 = vector.load %arg34[%c2, %c0_138, %c0_139] : memref<4x16x8xbf16, #tpu.memory_space<vmem>>, vector<1x16x8xbf16>
      %290 = vector.shape_cast %289 : vector<1x16x8xbf16> to vector<16x8xbf16>
      %291 = vector.shape_cast %288 : vector<16x8xbf16> to vector<1x16x8xbf16>
      tpu.vector_store %arg34[%c2, %c0_138, %c0_139], %291 {strides = array<i32>} : memref<4x16x8xbf16, #tpu.memory_space<vmem>>, vector<1x16x8xbf16>,
      %292 = vector.extract_strided_slice %236 {offsets = [0, 16], sizes = [16, 8], strides = [1, 1]} : vector<16x32xf32> to vector<16x8xf32>
      %293 = arith.truncf %292 : vector<16x8xf32> to vector<16x8xbf16>
      %c2_140 = arith.constant 2 : index
      %c0_141 = arith.constant 0 : index
      %c0_142 = arith.constant 0 : index
      %294 = vector.load %arg35[%c2_140, %c0_141, %c0_142] : memref<4x16x8xbf16, #tpu.memory_space<vmem>>, vector<1x16x8xbf16>
      %295 = vector.shape_cast %294 : vector<1x16x8xbf16> to vector<16x8xbf16>
      %296 = vector.shape_cast %293 : vector<16x8xbf16> to vector<1x16x8xbf16>
      tpu.vector_store %arg35[%c2_140, %c0_141, %c0_142], %296 {strides = array<i32>} : memref<4x16x8xbf16, #tpu.memory_space<vmem>>, vector<1x16x8xbf16>,
      %297 = vector.extract_strided_slice %241 {offsets = [0, 16], sizes = [16, 8], strides = [1, 1]} : vector<16x32xf32> to vector<16x8xf32>
      %298 = arith.truncf %297 : vector<16x8xf32> to vector<16x8xbf16>
      %c2_143 = arith.constant 2 : index
      %c0_144 = arith.constant 0 : index
      %c0_145 = arith.constant 0 : index
      %299 = vector.load %arg36[%c2_143, %c0_144, %c0_145] : memref<4x16x8xbf16, #tpu.memory_space<vmem>>, vector<1x16x8xbf16>
      %300 = vector.shape_cast %299 : vector<1x16x8xbf16> to vector<16x8xbf16>
      %301 = vector.shape_cast %298 : vector<16x8xbf16> to vector<1x16x8xbf16>
      tpu.vector_store %arg36[%c2_143, %c0_144, %c0_145], %301 {strides = array<i32>} : memref<4x16x8xbf16, #tpu.memory_space<vmem>>, vector<1x16x8xbf16>,
      %302 = vector.extract_strided_slice %246 {offsets = [0, 16], sizes = [16, 8], strides = [1, 1]} : vector<16x32xf32> to vector<16x8xf32>
      %303 = arith.truncf %302 : vector<16x8xf32> to vector<16x8xbf16>
      %c2_146 = arith.constant 2 : index
      %c0_147 = arith.constant 0 : index
      %c0_148 = arith.constant 0 : index
      %304 = vector.load %arg37[%c2_146, %c0_147, %c0_148] : memref<4x16x8xbf16, #tpu.memory_space<vmem>>, vector<1x16x8xbf16>
      %305 = vector.shape_cast %304 : vector<1x16x8xbf16> to vector<16x8xbf16>
      %306 = vector.shape_cast %303 : vector<16x8xbf16> to vector<1x16x8xbf16>
      tpu.vector_store %arg37[%c2_146, %c0_147, %c0_148], %306 {strides = array<i32>} : memref<4x16x8xbf16, #tpu.memory_space<vmem>>, vector<1x16x8xbf16>,
      %307 = vector.extract_strided_slice %231 {offsets = [0, 24], sizes = [16, 8], strides = [1, 1]} : vector<16x32xf32> to vector<16x8xf32>
      %308 = arith.truncf %307 : vector<16x8xf32> to vector<16x8xbf16>
      %c3 = arith.constant 3 : index
      %c0_149 = arith.constant 0 : index
      %c0_150 = arith.constant 0 : index
      %309 = vector.load %arg34[%c3, %c0_149, %c0_150] : memref<4x16x8xbf16, #tpu.memory_space<vmem>>, vector<1x16x8xbf16>
      %310 = vector.shape_cast %309 : vector<1x16x8xbf16> to vector<16x8xbf16>
      %311 = vector.shape_cast %308 : vector<16x8xbf16> to vector<1x16x8xbf16>
      tpu.vector_store %arg34[%c3, %c0_149, %c0_150], %311 {strides = array<i32>} : memref<4x16x8xbf16, #tpu.memory_space<vmem>>, vector<1x16x8xbf16>,
      %312 = vector.extract_strided_slice %236 {offsets = [0, 24], sizes = [16, 8], strides = [1, 1]} : vector<16x32xf32> to vector<16x8xf32>
      %313 = arith.truncf %312 : vector<16x8xf32> to vector<16x8xbf16>
      %c3_151 = arith.constant 3 : index
      %c0_152 = arith.constant 0 : index
      %c0_153 = arith.constant 0 : index
      %314 = vector.load %arg35[%c3_151, %c0_152, %c0_153] : memref<4x16x8xbf16, #tpu.memory_space<vmem>>, vector<1x16x8xbf16>
      %315 = vector.shape_cast %314 : vector<1x16x8xbf16> to vector<16x8xbf16>
      %316 = vector.shape_cast %313 : vector<16x8xbf16> to vector<1x16x8xbf16>
      tpu.vector_store %arg35[%c3_151, %c0_152, %c0_153], %316 {strides = array<i32>} : memref<4x16x8xbf16, #tpu.memory_space<vmem>>, vector<1x16x8xbf16>,
      %317 = vector.extract_strided_slice %241 {offsets = [0, 24], sizes = [16, 8], strides = [1, 1]} : vector<16x32xf32> to vector<16x8xf32>
      %318 = arith.truncf %317 : vector<16x8xf32> to vector<16x8xbf16>
      %c3_154 = arith.constant 3 : index
      %c0_155 = arith.constant 0 : index
      %c0_156 = arith.constant 0 : index
      %319 = vector.load %arg36[%c3_154, %c0_155, %c0_156] : memref<4x16x8xbf16, #tpu.memory_space<vmem>>, vector<1x16x8xbf16>
      %320 = vector.shape_cast %319 : vector<1x16x8xbf16> to vector<16x8xbf16>
      %321 = vector.shape_cast %318 : vector<16x8xbf16> to vector<1x16x8xbf16>
      tpu.vector_store %arg36[%c3_154, %c0_155, %c0_156], %321 {strides = array<i32>} : memref<4x16x8xbf16, #tpu.memory_space<vmem>>, vector<1x16x8xbf16>,
      %322 = vector.extract_strided_slice %246 {offsets = [0, 24], sizes = [16, 8], strides = [1, 1]} : vector<16x32xf32> to vector<16x8xf32>
      %323 = arith.truncf %322 : vector<16x8xf32> to vector<16x8xbf16>
      %c3_157 = arith.constant 3 : index
      %c0_158 = arith.constant 0 : index
      %c0_159 = arith.constant 0 : index
      %324 = vector.load %arg37[%c3_157, %c0_158, %c0_159] : memref<4x16x8xbf16, #tpu.memory_space<vmem>>, vector<1x16x8xbf16>
      %325 = vector.shape_cast %324 : vector<1x16x8xbf16> to vector<16x8xbf16>
      %326 = vector.shape_cast %323 : vector<16x8xbf16> to vector<1x16x8xbf16>
      tpu.vector_store %arg37[%c3_157, %c0_158, %c0_159], %326 {strides = array<i32>} : memref<4x16x8xbf16, #tpu.memory_space<vmem>>, vector<1x16x8xbf16>,
    } else {
    }
    %c8_i32 = arith.constant 8 : i32
    %7 = arith.muli %arg1, %c8_i32 : i32
    %8 = tpu.iota {dimensions = array<i32: 0>} : vector<8x16xi32>
    %9 = vector.broadcast %7 : i32 to vector<8x16xi32>
    %10 = arith.addi %9, %8 : vector<8x16xi32>
    %11 = tpu.iota {dimensions = array<i32: 1>} : vector<8x16xi32>
    %12 = arith.cmpi sle, %11, %10 : vector<8x16xi32>
    %13 = vector.broadcast %1 : i32 to vector<8x16xi32>
    %14 = arith.cmpi slt, %11, %13 : vector<8x16xi32>
    %15 = arith.andi %12, %14 : vector<8x16xi1>
    %cst = arith.constant 0.000000e+00 : f32
    %cst_1 = arith.constant -1.000000e+30 : f32
    %16 = vector.broadcast %cst : f32 to vector<8x16xf32>
    %17 = vector.broadcast %cst_1 : f32 to vector<8x16xf32>
    %18 = arith.select %15, %16, %17 : vector<8x16xi1>, vector<8x16xf32>
    %19 = tpu.iota {dimensions = array<i32: 1>} : vector<8x16xi32>
    %20 = vector.broadcast %3 : i32 to vector<8x16xi32>
    %21 = arith.cmpi slt, %19, %20 : vector<8x16xi32>
    %cst_2 = arith.constant 0.000000e+00 : f32
    %cst_3 = arith.constant -1.000000e+30 : f32
    %22 = vector.broadcast %cst_2 : f32 to vector<8x16xf32>
    %23 = vector.broadcast %cst_3 : f32 to vector<8x16xf32>
    %24 = arith.select %21, %22, %23 : vector<8x16xi1>, vector<8x16xf32>
    %c0 = arith.constant 0 : index
    %c0_4 = arith.constant 0 : index
    %c0_5 = arith.constant 0 : index
    %25 = vector.load %arg4[%c0, %c0_4, %c0_5] : memref<1x8x32xf32, #tpu.memory_space<vmem>>, vector<1x8x32xf32>
    %26 = vector.shape_cast %25 : vector<1x8x32xf32> to vector<8x32xf32>
    %c0_6 = arith.constant 0 : index
    %c0_7 = arith.constant 0 : index
    %27 = vector.load %arg15[%c0_6, %c0_7] : memref<1x32xf32, #tpu.memory_space<vmem>>, vector<1x32xf32>
    %c0_8 = arith.constant 0 : index
    %c0_9 = arith.constant 0 : index
    %28 = vector.load %arg16[%c0_8, %c0_9] : memref<1x32xf32, #tpu.memory_space<vmem>>, vector<1x32xf32>
    %cst_10 = arith.constant dense<0.000000e+00> : vector<8xf32>
    %29 = vector.multi_reduction <add>, %26, %cst_10 [1] : vector<8x32xf32> to vector<8xf32>
    %30 = vector.shape_cast %29 : vector<8xf32> to vector<8x1xf32>
    %cst_11 = arith.constant 3.200000e+01 : f32
    %31 = vector.broadcast %cst_11 : f32 to vector<8x1xf32>
    %32 = arith.divf %30, %31 : vector<8x1xf32>
    %33 = vector.broadcast %32 : vector<8x1xf32> to vector<8x32xf32>
    %34 = arith.subf %26, %33 : vector<8x32xf32>
    %35 = arith.mulf %34, %34 : vector<8x32xf32>
    %cst_12 = arith.constant dense<0.000000e+00> : vector<8xf32>
    %36 = vector.multi_reduction <add>, %35, %cst_12 [1] : vector<8x32xf32> to vector<8xf32>
    %37 = vector.shape_cast %36 : vector<8xf32> to vector<8x1xf32>
    %cst_13 = arith.constant 3.200000e+01 : f32
    %38 = vector.broadcast %cst_13 : f32 to vector<8x1xf32>
    %39 = arith.divf %37, %38 : vector<8x1xf32>
    %40 = vector.broadcast %32 : vector<8x1xf32> to vector<8x32xf32>
    %41 = arith.subf %26, %40 : vector<8x32xf32>
    %cst_14 = arith.constant 9.99999997E-7 : f32
    %42 = vector.broadcast %cst_14 : f32 to vector<8x1xf32>
    %43 = arith.addf %39, %42 : vector<8x1xf32>
    %44 = math.rsqrt %43 : vector<8x1xf32>
    %45 = vector.broadcast %44 : vector<8x1xf32> to vector<8x32xf32>
    %46 = arith.mulf %41, %45 : vector<8x32xf32>
    %47 = vector.broadcast %27 : vector<1x32xf32> to vector<8x32xf32>
    %48 = arith.mulf %46, %47 : vector<8x32xf32>
    %49 = vector.broadcast %28 : vector<1x32xf32> to vector<8x32xf32>
    %50 = arith.addf %48, %49 : vector<8x32xf32>
    %c0_15 = arith.constant 0 : index
    %c0_16 = arith.constant 0 : index
    %c0_17 = arith.constant 0 : index
    %51 = vector.load %arg34[%c0_15, %c0_16, %c0_17] : memref<4x16x8xbf16, #tpu.memory_space<vmem>>, vector<4x16x8xbf16>
    %c0_18 = arith.constant 0 : index
    %c0_19 = arith.constant 0 : index
    %c0_20 = arith.constant 0 : index
    %52 = vector.load %arg35[%c0_18, %c0_19, %c0_20] : memref<4x16x8xbf16, #tpu.memory_space<vmem>>, vector<4x16x8xbf16>
    %c0_21 = arith.constant 0 : index
    %c0_22 = arith.constant 0 : index
    %53 = vector.load %arg7[%c0_21, %c0_22] : memref<32x32xbf16, #tpu.memory_space<vmem>>, vector<32x32xbf16>
    %c0_23 = arith.constant 0 : index
    %c0_24 = arith.constant 0 : index
    %54 = vector.load %arg8[%c0_23, %c0_24] : memref<1x32xf32, #tpu.memory_space<vmem>>, vector<1x32xf32>
    %c0_25 = arith.constant 0 : index
    %c0_26 = arith.constant 0 : index
    %55 = vector.load %arg13[%c0_25, %c0_26] : memref<32x32xbf16, #tpu.memory_space<vmem>>, vector<32x32xbf16>
    %c0_27 = arith.constant 0 : index
    %c0_28 = arith.constant 0 : index
    %56 = vector.load %arg14[%c0_27, %c0_28] : memref<1x32xf32, #tpu.memory_space<vmem>>, vector<1x32xf32>
    %57 = arith.truncf %50 : vector<8x32xf32> to vector<8x32xbf16>
    %cst_29 = arith.constant dense<0.000000e+00> : vector<8x32xf32>
    %58 = tpu.matmul %57, %53, %cst_29 {dimension_numbers = #tpu.dot_dimension_numbers<[1], [0], [0], [1], [0, 0, 1, 1], [], []>} : vector<8x32xbf16>, vector<32x32xbf16>, vector<8x32xf32> -> vector<8x32xf32>
    %59 = vector.broadcast %54 : vector<1x32xf32> to vector<8x32xf32>
    %60 = arith.addf %58, %59 : vector<8x32xf32>
    %61 = vector.extract_strided_slice %60 {offsets = [0, 0], sizes = [8, 8], strides = [1, 1]} : vector<8x32xf32> to vector<8x8xf32>
    %62 = vector.extract_strided_slice %60 {offsets = [0, 8], sizes = [8, 8], strides = [1, 1]} : vector<8x32xf32> to vector<8x8xf32>
    %63 = vector.extract_strided_slice %60 {offsets = [0, 16], sizes = [8, 8], strides = [1, 1]} : vector<8x32xf32> to vector<8x8xf32>
    %64 = vector.extract_strided_slice %60 {offsets = [0, 24], sizes = [8, 8], strides = [1, 1]} : vector<8x32xf32> to vector<8x8xf32>
    %65 = vector.shape_cast %61 : vector<8x8xf32> to vector<1x8x8xf32>
    %66 = vector.shape_cast %62 : vector<8x8xf32> to vector<1x8x8xf32>
    %67 = vector.shape_cast %63 : vector<8x8xf32> to vector<1x8x8xf32>
    %68 = vector.shape_cast %64 : vector<8x8xf32> to vector<1x8x8xf32>
    %69 = tpu.concatenate %65, %66, %67, %68 in 0 : vector<1x8x8xf32>, vector<1x8x8xf32>, vector<1x8x8xf32>, vector<1x8x8xf32> -> vector<4x8x8xf32>
    %70 = arith.truncf %69 : vector<4x8x8xf32> to vector<4x8x8xbf16>
    "tpu.trace_start"() <{level = 10 : i32, message = "hqd,hkd->hqk"}> : () -> ()
    %cst_30 = arith.constant dense<0.000000e+00> : vector<4x8x16xf32>
    %71 = tpu.matmul %70, %51, %cst_30 {dimension_numbers = #tpu.dot_dimension_numbers<[2], [2], [1], [1], [0, 0, 0, 1, 1, 1], [0], [0]>} : vector<4x8x8xbf16>, vector<4x16x8xbf16>, vector<4x8x16xf32> -> vector<4x8x16xf32>
    "tpu.trace_stop"() : () -> ()
    %72 = vector.shape_cast %18 : vector<8x16xf32> to vector<1x8x16xf32>
    %73 = vector.broadcast %72 : vector<1x8x16xf32> to vector<4x8x16xf32>
    %74 = arith.addf %71, %73 : vector<4x8x16xf32>
    %cst_31 = arith.constant dense<0xFF800000> : vector<4x8xf32>
    %75 = vector.multi_reduction <maximumf>, %74, %cst_31 [2] : vector<4x8x16xf32> to vector<4x8xf32>
    %76 = vector.shape_cast %75 : vector<4x8xf32> to vector<4x8x1xf32>
    %77 = vector.broadcast %76 : vector<4x8x1xf32> to vector<4x8x16xf32>
    %78 = arith.subf %74, %77 : vector<4x8x16xf32>
    %79 = math.exp %78 : vector<4x8x16xf32>
    %cst_32 = arith.constant dense<0.000000e+00> : vector<4x8xf32>
    %80 = vector.multi_reduction <add>, %79, %cst_32 [2] : vector<4x8x16xf32> to vector<4x8xf32>
    %81 = vector.shape_cast %80 : vector<4x8xf32> to vector<4x8x1xf32>
    %82 = arith.truncf %79 : vector<4x8x16xf32> to vector<4x8x16xbf16>
    "tpu.trace_start"() <{level = 10 : i32, message = "hqk,hkd->hqd"}> : () -> ()
    %cst_33 = arith.constant dense<0.000000e+00> : vector<4x8x8xf32>
    %83 = tpu.matmul %82, %52, %cst_33 {dimension_numbers = #tpu.dot_dimension_numbers<[2], [1], [1], [2], [0, 0, 0, 1, 1, 2], [0], [0]>} : vector<4x8x16xbf16>, vector<4x16x8xbf16>, vector<4x8x8xf32> -> vector<4x8x8xf32>
    "tpu.trace_stop"() : () -> ()
    %84 = tpu.reciprocal %81 {approx = true} : vector<4x8x1xf32> -> vector<4x8x1xf32>
    %85 = vector.broadcast %84 : vector<4x8x1xf32> to vector<4x8x8xf32>
    %86 = arith.mulf %83, %85 : vector<4x8x8xf32>
    %87 = vector.extract_strided_slice %86 {offsets = [0, 0, 0], sizes = [1, 8, 8], strides = [1, 1, 1]} : vector<4x8x8xf32> to vector<1x8x8xf32>
    %88 = vector.shape_cast %87 : vector<1x8x8xf32> to vector<8x8xf32>
    %89 = vector.extract_strided_slice %86 {offsets = [1, 0, 0], sizes = [1, 8, 8], strides = [1, 1, 1]} : vector<4x8x8xf32> to vector<1x8x8xf32>
    %90 = vector.shape_cast %89 : vector<1x8x8xf32> to vector<8x8xf32>
    %91 = vector.extract_strided_slice %86 {offsets = [2, 0, 0], sizes = [1, 8, 8], strides = [1, 1, 1]} : vector<4x8x8xf32> to vector<1x8x8xf32>
    %92 = vector.shape_cast %91 : vector<1x8x8xf32> to vector<8x8xf32>
    %93 = vector.extract_strided_slice %86 {offsets = [3, 0, 0], sizes = [1, 8, 8], strides = [1, 1, 1]} : vector<4x8x8xf32> to vector<1x8x8xf32>
    %94 = vector.shape_cast %93 : vector<1x8x8xf32> to vector<8x8xf32>
    %95 = tpu.concatenate %88, %90, %92, %94 in 1 : vector<8x8xf32>, vector<8x8xf32>, vector<8x8xf32>, vector<8x8xf32> -> vector<8x32xf32>
    %96 = arith.truncf %95 : vector<8x32xf32> to vector<8x32xbf16>
    %cst_34 = arith.constant dense<0.000000e+00> : vector<8x32xf32>
    %97 = tpu.matmul %96, %55, %cst_34 {dimension_numbers = #tpu.dot_dimension_numbers<[1], [0], [0], [1], [0, 0, 1, 1], [], []>} : vector<8x32xbf16>, vector<32x32xbf16>, vector<8x32xf32> -> vector<8x32xf32>
    %98 = vector.broadcast %56 : vector<1x32xf32> to vector<8x32xf32>
    %99 = arith.addf %97, %98 : vector<8x32xf32>
    %100 = arith.addf %99, %26 : vector<8x32xf32>
    %c0_35 = arith.constant 0 : index
    %c0_36 = arith.constant 0 : index
    %101 = vector.load %arg25[%c0_35, %c0_36] : memref<1x32xf32, #tpu.memory_space<vmem>>, vector<1x32xf32>
    %c0_37 = arith.constant 0 : index
    %c0_38 = arith.constant 0 : index
    %102 = vector.load %arg26[%c0_37, %c0_38] : memref<1x32xf32, #tpu.memory_space<vmem>>, vector<1x32xf32>
    %cst_39 = arith.constant dense<0.000000e+00> : vector<8xf32>
    %103 = vector.multi_reduction <add>, %100, %cst_39 [1] : vector<8x32xf32> to vector<8xf32>
    %104 = vector.shape_cast %103 : vector<8xf32> to vector<8x1xf32>
    %cst_40 = arith.constant 3.200000e+01 : f32
    %105 = vector.broadcast %cst_40 : f32 to vector<8x1xf32>
    %106 = arith.divf %104, %105 : vector<8x1xf32>
    %107 = vector.broadcast %106 : vector<8x1xf32> to vector<8x32xf32>
    %108 = arith.subf %100, %107 : vector<8x32xf32>
    %109 = arith.mulf %108, %108 : vector<8x32xf32>
    %cst_41 = arith.constant dense<0.000000e+00> : vector<8xf32>
    %110 = vector.multi_reduction <add>, %109, %cst_41 [1] : vector<8x32xf32> to vector<8xf32>
    %111 = vector.shape_cast %110 : vector<8xf32> to vector<8x1xf32>
    %cst_42 = arith.constant 3.200000e+01 : f32
    %112 = vector.broadcast %cst_42 : f32 to vector<8x1xf32>
    %113 = arith.divf %111, %112 : vector<8x1xf32>
    %114 = vector.broadcast %106 : vector<8x1xf32> to vector<8x32xf32>
    %115 = arith.subf %100, %114 : vector<8x32xf32>
    %cst_43 = arith.constant 9.99999997E-7 : f32
    %116 = vector.broadcast %cst_43 : f32 to vector<8x1xf32>
    %117 = arith.addf %113, %116 : vector<8x1xf32>
    %118 = math.rsqrt %117 : vector<8x1xf32>
    %119 = vector.broadcast %118 : vector<8x1xf32> to vector<8x32xf32>
    %120 = arith.mulf %115, %119 : vector<8x32xf32>
    %121 = vector.broadcast %101 : vector<1x32xf32> to vector<8x32xf32>
    %122 = arith.mulf %120, %121 : vector<8x32xf32>
    %123 = vector.broadcast %102 : vector<1x32xf32> to vector<8x32xf32>
    %124 = arith.addf %122, %123 : vector<8x32xf32>
    %c0_44 = arith.constant 0 : index
    %c0_45 = arith.constant 0 : index
    %c0_46 = arith.constant 0 : index
    %125 = vector.load %arg36[%c0_44, %c0_45, %c0_46] : memref<4x16x8xbf16, #tpu.memory_space<vmem>>, vector<4x16x8xbf16>
    %c0_47 = arith.constant 0 : index
    %c0_48 = arith.constant 0 : index
    %c0_49 = arith.constant 0 : index
    %126 = vector.load %arg37[%c0_47, %c0_48, %c0_49] : memref<4x16x8xbf16, #tpu.memory_space<vmem>>, vector<4x16x8xbf16>
    %c0_50 = arith.constant 0 : index
    %c0_51 = arith.constant 0 : index
    %127 = vector.load %arg17[%c0_50, %c0_51] : memref<32x32xbf16, #tpu.memory_space<vmem>>, vector<32x32xbf16>
    %c0_52 = arith.constant 0 : index
    %c0_53 = arith.constant 0 : index
    %128 = vector.load %arg18[%c0_52, %c0_53] : memref<1x32xf32, #tpu.memory_space<vmem>>, vector<1x32xf32>
    %c0_54 = arith.constant 0 : index
    %c0_55 = arith.constant 0 : index
    %129 = vector.load %arg23[%c0_54, %c0_55] : memref<32x32xbf16, #tpu.memory_space<vmem>>, vector<32x32xbf16>
    %c0_56 = arith.constant 0 : index
    %c0_57 = arith.constant 0 : index
    %130 = vector.load %arg24[%c0_56, %c0_57] : memref<1x32xf32, #tpu.memory_space<vmem>>, vector<1x32xf32>
    %131 = arith.truncf %124 : vector<8x32xf32> to vector<8x32xbf16>
    %cst_58 = arith.constant dense<0.000000e+00> : vector<8x32xf32>
    %132 = tpu.matmul %131, %127, %cst_58 {dimension_numbers = #tpu.dot_dimension_numbers<[1], [0], [0], [1], [0, 0, 1, 1], [], []>} : vector<8x32xbf16>, vector<32x32xbf16>, vector<8x32xf32> -> vector<8x32xf32>
    %133 = vector.broadcast %128 : vector<1x32xf32> to vector<8x32xf32>
    %134 = arith.addf %132, %133 : vector<8x32xf32>
    %135 = vector.extract_strided_slice %134 {offsets = [0, 0], sizes = [8, 8], strides = [1, 1]} : vector<8x32xf32> to vector<8x8xf32>
    %136 = vector.extract_strided_slice %134 {offsets = [0, 8], sizes = [8, 8], strides = [1, 1]} : vector<8x32xf32> to vector<8x8xf32>
    %137 = vector.extract_strided_slice %134 {offsets = [0, 16], sizes = [8, 8], strides = [1, 1]} : vector<8x32xf32> to vector<8x8xf32>
    %138 = vector.extract_strided_slice %134 {offsets = [0, 24], sizes = [8, 8], strides = [1, 1]} : vector<8x32xf32> to vector<8x8xf32>
    %139 = vector.shape_cast %135 : vector<8x8xf32> to vector<1x8x8xf32>
    %140 = vector.shape_cast %136 : vector<8x8xf32> to vector<1x8x8xf32>
    %141 = vector.shape_cast %137 : vector<8x8xf32> to vector<1x8x8xf32>
    %142 = vector.shape_cast %138 : vector<8x8xf32> to vector<1x8x8xf32>
    %143 = tpu.concatenate %139, %140, %141, %142 in 0 : vector<1x8x8xf32>, vector<1x8x8xf32>, vector<1x8x8xf32>, vector<1x8x8xf32> -> vector<4x8x8xf32>
    %144 = arith.truncf %143 : vector<4x8x8xf32> to vector<4x8x8xbf16>
    "tpu.trace_start"() <{level = 10 : i32, message = "hqd,hkd->hqk"}> : () -> ()
    %cst_59 = arith.constant dense<0.000000e+00> : vector<4x8x16xf32>
    %145 = tpu.matmul %144, %125, %cst_59 {dimension_numbers = #tpu.dot_dimension_numbers<[2], [2], [1], [1], [0, 0, 0, 1, 1, 1], [0], [0]>} : vector<4x8x8xbf16>, vector<4x16x8xbf16>, vector<4x8x16xf32> -> vector<4x8x16xf32>
    "tpu.trace_stop"() : () -> ()
    %146 = vector.shape_cast %24 : vector<8x16xf32> to vector<1x8x16xf32>
    %147 = vector.broadcast %146 : vector<1x8x16xf32> to vector<4x8x16xf32>
    %148 = arith.addf %145, %147 : vector<4x8x16xf32>
    %cst_60 = arith.constant dense<0xFF800000> : vector<4x8xf32>
    %149 = vector.multi_reduction <maximumf>, %148, %cst_60 [2] : vector<4x8x16xf32> to vector<4x8xf32>
    %150 = vector.shape_cast %149 : vector<4x8xf32> to vector<4x8x1xf32>
    %151 = vector.broadcast %150 : vector<4x8x1xf32> to vector<4x8x16xf32>
    %152 = arith.subf %148, %151 : vector<4x8x16xf32>
    %153 = math.exp %152 : vector<4x8x16xf32>
    %cst_61 = arith.constant dense<0.000000e+00> : vector<4x8xf32>
    %154 = vector.multi_reduction <add>, %153, %cst_61 [2] : vector<4x8x16xf32> to vector<4x8xf32>
    %155 = vector.shape_cast %154 : vector<4x8xf32> to vector<4x8x1xf32>
    %156 = arith.truncf %153 : vector<4x8x16xf32> to vector<4x8x16xbf16>
    "tpu.trace_start"() <{level = 10 : i32, message = "hqk,hkd->hqd"}> : () -> ()
    %cst_62 = arith.constant dense<0.000000e+00> : vector<4x8x8xf32>
    %157 = tpu.matmul %156, %126, %cst_62 {dimension_numbers = #tpu.dot_dimension_numbers<[2], [1], [1], [2], [0, 0, 0, 1, 1, 2], [0], [0]>} : vector<4x8x16xbf16>, vector<4x16x8xbf16>, vector<4x8x8xf32> -> vector<4x8x8xf32>
    "tpu.trace_stop"() : () -> ()
    %158 = tpu.reciprocal %155 {approx = true} : vector<4x8x1xf32> -> vector<4x8x1xf32>
    %159 = vector.broadcast %158 : vector<4x8x1xf32> to vector<4x8x8xf32>
    %160 = arith.mulf %157, %159 : vector<4x8x8xf32>
    %161 = vector.extract_strided_slice %160 {offsets = [0, 0, 0], sizes = [1, 8, 8], strides = [1, 1, 1]} : vector<4x8x8xf32> to vector<1x8x8xf32>
    %162 = vector.shape_cast %161 : vector<1x8x8xf32> to vector<8x8xf32>
    %163 = vector.extract_strided_slice %160 {offsets = [1, 0, 0], sizes = [1, 8, 8], strides = [1, 1, 1]} : vector<4x8x8xf32> to vector<1x8x8xf32>
    %164 = vector.shape_cast %163 : vector<1x8x8xf32> to vector<8x8xf32>
    %165 = vector.extract_strided_slice %160 {offsets = [2, 0, 0], sizes = [1, 8, 8], strides = [1, 1, 1]} : vector<4x8x8xf32> to vector<1x8x8xf32>
    %166 = vector.shape_cast %165 : vector<1x8x8xf32> to vector<8x8xf32>
    %167 = vector.extract_strided_slice %160 {offsets = [3, 0, 0], sizes = [1, 8, 8], strides = [1, 1, 1]} : vector<4x8x8xf32> to vector<1x8x8xf32>
    %168 = vector.shape_cast %167 : vector<1x8x8xf32> to vector<8x8xf32>
    %169 = tpu.concatenate %162, %164, %166, %168 in 1 : vector<8x8xf32>, vector<8x8xf32>, vector<8x8xf32>, vector<8x8xf32> -> vector<8x32xf32>
    %170 = arith.truncf %169 : vector<8x32xf32> to vector<8x32xbf16>
    %cst_63 = arith.constant dense<0.000000e+00> : vector<8x32xf32>
    %171 = tpu.matmul %170, %129, %cst_63 {dimension_numbers = #tpu.dot_dimension_numbers<[1], [0], [0], [1], [0, 0, 1, 1], [], []>} : vector<8x32xbf16>, vector<32x32xbf16>, vector<8x32xf32> -> vector<8x32xf32>
    %172 = vector.broadcast %130 : vector<1x32xf32> to vector<8x32xf32>
    %173 = arith.addf %171, %172 : vector<8x32xf32>
    %174 = arith.addf %173, %100 : vector<8x32xf32>
    %c0_64 = arith.constant 0 : index
    %c0_65 = arith.constant 0 : index
    %175 = vector.load %arg31[%c0_64, %c0_65] : memref<1x32xf32, #tpu.memory_space<vmem>>, vector<1x32xf32>
    %c0_66 = arith.constant 0 : index
    %c0_67 = arith.constant 0 : index
    %176 = vector.load %arg32[%c0_66, %c0_67] : memref<1x32xf32, #tpu.memory_space<vmem>>, vector<1x32xf32>
    %cst_68 = arith.constant dense<0.000000e+00> : vector<8xf32>
    %177 = vector.multi_reduction <add>, %174, %cst_68 [1] : vector<8x32xf32> to vector<8xf32>
    %178 = vector.shape_cast %177 : vector<8xf32> to vector<8x1xf32>
    %cst_69 = arith.constant 3.200000e+01 : f32
    %179 = vector.broadcast %cst_69 : f32 to vector<8x1xf32>
    %180 = arith.divf %178, %179 : vector<8x1xf32>
    %181 = vector.broadcast %180 : vector<8x1xf32> to vector<8x32xf32>
    %182 = arith.subf %174, %181 : vector<8x32xf32>
    %183 = arith.mulf %182, %182 : vector<8x32xf32>
    %cst_70 = arith.constant dense<0.000000e+00> : vector<8xf32>
    %184 = vector.multi_reduction <add>, %183, %cst_70 [1] : vector<8x32xf32> to vector<8xf32>
    %185 = vector.shape_cast %184 : vector<8xf32> to vector<8x1xf32>
    %cst_71 = arith.constant 3.200000e+01 : f32
    %186 = vector.broadcast %cst_71 : f32 to vector<8x1xf32>
    %187 = arith.divf %185, %186 : vector<8x1xf32>
    %188 = vector.broadcast %180 : vector<8x1xf32> to vector<8x32xf32>
    %189 = arith.subf %174, %188 : vector<8x32xf32>
    %cst_72 = arith.constant 9.99999997E-7 : f32
    %190 = vector.broadcast %cst_72 : f32 to vector<8x1xf32>
    %191 = arith.addf %187, %190 : vector<8x1xf32>
    %192 = math.rsqrt %191 : vector<8x1xf32>
    %193 = vector.broadcast %192 : vector<8x1xf32> to vector<8x32xf32>
    %194 = arith.mulf %189, %193 : vector<8x32xf32>
    %195 = vector.broadcast %175 : vector<1x32xf32> to vector<8x32xf32>
    %196 = arith.mulf %194, %195 : vector<8x32xf32>
    %197 = vector.broadcast %176 : vector<1x32xf32> to vector<8x32xf32>
    %198 = arith.addf %196, %197 : vector<8x32xf32>
    %199 = arith.truncf %198 : vector<8x32xf32> to vector<8x32xbf16>
    %c0_73 = arith.constant 0 : index
    %c0_74 = arith.constant 0 : index
    %200 = vector.load %arg27[%c0_73, %c0_74] : memref<32x64xbf16, #tpu.memory_space<vmem>>, vector<32x64xbf16>
    %cst_75 = arith.constant dense<0.000000e+00> : vector<8x64xf32>
    %201 = tpu.matmul %199, %200, %cst_75 {dimension_numbers = #tpu.dot_dimension_numbers<[1], [0], [0], [1], [0, 0, 1, 1], [], []>} : vector<8x32xbf16>, vector<32x64xbf16>, vector<8x64xf32> -> vector<8x64xf32>
    %c0_76 = arith.constant 0 : index
    %c0_77 = arith.constant 0 : index
    %202 = vector.load %arg28[%c0_76, %c0_77] : memref<1x64xf32, #tpu.memory_space<vmem>>, vector<1x64xf32>
    %203 = vector.broadcast %202 : vector<1x64xf32> to vector<8x64xf32>
    %204 = arith.addf %201, %203 : vector<8x64xf32>
    %cst_78 = arith.constant 0.000000e+00 : f32
    %205 = vector.broadcast %cst_78 : f32 to vector<8x64xf32>
    %206 = arith.subf %205, %204 : vector<8x64xf32>
    %207 = math.exp %206 : vector<8x64xf32>
    %cst_79 = arith.constant 1.000000e+00 : f32
    %208 = vector.broadcast %cst_79 : f32 to vector<8x64xf32>
    %209 = arith.addf %208, %207 : vector<8x64xf32>
    %cst_80 = arith.constant 1.000000e+00 : f32
    %210 = vector.broadcast %cst_80 : f32 to vector<8x64xf32>
    %211 = arith.divf %210, %209 : vector<8x64xf32>
    %212 = arith.mulf %204, %211 : vector<8x64xf32>
    %213 = arith.truncf %212 : vector<8x64xf32> to vector<8x64xbf16>
    %c0_81 = arith.constant 0 : index
    %c0_82 = arith.constant 0 : index
    %214 = vector.load %arg29[%c0_81, %c0_82] : memref<64x32xbf16, #tpu.memory_space<vmem>>, vector<64x32xbf16>
    %cst_83 = arith.constant dense<0.000000e+00> : vector<8x32xf32>
    %215 = tpu.matmul %213, %214, %cst_83 {dimension_numbers = #tpu.dot_dimension_numbers<[1], [0], [0], [1], [0, 0, 1, 1], [], []>} : vector<8x64xbf16>, vector<64x32xbf16>, vector<8x32xf32> -> vector<8x32xf32>
    %c0_84 = arith.constant 0 : index
    %c0_85 = arith.constant 0 : index
    %216 = vector.load %arg30[%c0_84, %c0_85] : memref<1x32xf32, #tpu.memory_space<vmem>>, vector<1x32xf32>
    %217 = vector.broadcast %216 : vector<1x32xf32> to vector<8x32xf32>
    %218 = arith.addf %215, %217 : vector<8x32xf32>
    %219 = arith.addf %218, %174 : vector<8x32xf32>
    %c0_86 = arith.constant 0 : index
    %c0_87 = arith.constant 0 : index
    %c0_88 = arith.constant 0 : index
    %220 = vector.load %arg33[%c0_86, %c0_87, %c0_88] : memref<1x8x32xf32, #tpu.memory_space<vmem>>, vector<1x8x32xf32>
    %221 = vector.shape_cast %220 : vector<1x8x32xf32> to vector<8x32xf32>
    %222 = vector.shape_cast %219 : vector<8x32xf32> to vector<1x8x32xf32>
    tpu.vector_store %arg33[%c0_86, %c0_87, %c0_88], %222 {strides = array<i32>} : memref<1x8x32xf32, #tpu.memory_space<vmem>>, vector<1x8x32xf32>,
    return
  }
  func.func @transform_0(%arg0: i32, %arg1: i32, %arg2: memref<2xi32, #tpu.memory_space<smem>>, %arg3: memref<2xi32, #tpu.memory_space<smem>>) -> (i32, i32, i32) {
    %c0_i32 = arith.constant 0 : i32
    %c0_i32_0 = arith.constant 0 : i32
    return %arg0, %arg1, %c0_i32 : i32, i32, i32
  }
  func.func @transform_1(%arg0: i32, %arg1: i32, %arg2: memref<2xi32, #tpu.memory_space<smem>>, %arg3: memref<2xi32, #tpu.memory_space<smem>>) -> (i32, i32, i32) {
    %c0_i32 = arith.constant 0 : i32
    %c0_i32_0 = arith.constant 0 : i32
    %c0_i32_1 = arith.constant 0 : i32
    return %arg0, %c0_i32, %c0_i32_0 : i32, i32, i32
  }
  func.func @transform_2(%arg0: i32, %arg1: i32, %arg2: memref<2xi32, #tpu.memory_space<smem>>, %arg3: memref<2xi32, #tpu.memory_space<smem>>) -> (i32, i32, i32) {
    %c0_i32 = arith.constant 0 : i32
    %c0_i32_0 = arith.constant 0 : i32
    %c0_i32_1 = arith.constant 0 : i32
    return %arg0, %c0_i32, %c0_i32_0 : i32, i32, i32
  }
  func.func @transform_3(%arg0: i32, %arg1: i32, %arg2: memref<2xi32, #tpu.memory_space<smem>>, %arg3: memref<2xi32, #tpu.memory_space<smem>>) -> (i32, i32) {
    %c0_i32 = arith.constant 0 : i32
    %c0_i32_0 = arith.constant 0 : i32
    %c0_i32_1 = arith.constant 0 : i32
    return %c0_i32, %c0_i32_0 : i32, i32
  }
  func.func @transform_4(%arg0: i32, %arg1: i32, %arg2: memref<2xi32, #tpu.memory_space<smem>>, %arg3: memref<2xi32, #tpu.memory_space<smem>>) -> (i32, i32) {
    %c0_i32 = arith.constant 0 : i32
    %c0_i32_0 = arith.constant 0 : i32
    %c0_i32_1 = arith.constant 0 : i32
    return %c0_i32, %c0_i32_0 : i32, i32
  }
  func.func @transform_5(%arg0: i32, %arg1: i32, %arg2: memref<2xi32, #tpu.memory_space<smem>>, %arg3: memref<2xi32, #tpu.memory_space<smem>>) -> (i32, i32) {
    %c0_i32 = arith.constant 0 : i32
    %c0_i32_0 = arith.constant 0 : i32
    %c0_i32_1 = arith.constant 0 : i32
    return %c0_i32, %c0_i32_0 : i32, i32
  }
  func.func @transform_6(%arg0: i32, %arg1: i32, %arg2: memref<2xi32, #tpu.memory_space<smem>>, %arg3: memref<2xi32, #tpu.memory_space<smem>>) -> (i32, i32) {
    %c0_i32 = arith.constant 0 : i32
    %c0_i32_0 = arith.constant 0 : i32
    %c0_i32_1 = arith.constant 0 : i32
    return %c0_i32, %c0_i32_0 : i32, i32
  }
  func.func @transform_7(%arg0: i32, %arg1: i32, %arg2: memref<2xi32, #tpu.memory_space<smem>>, %arg3: memref<2xi32, #tpu.memory_space<smem>>) -> (i32, i32) {
    %c0_i32 = arith.constant 0 : i32
    %c0_i32_0 = arith.constant 0 : i32
    %c0_i32_1 = arith.constant 0 : i32
    return %c0_i32, %c0_i32_0 : i32, i32
  }
  func.func @transform_8(%arg0: i32, %arg1: i32, %arg2: memref<2xi32, #tpu.memory_space<smem>>, %arg3: memref<2xi32, #tpu.memory_space<smem>>) -> (i32, i32) {
    %c0_i32 = arith.constant 0 : i32
    %c0_i32_0 = arith.constant 0 : i32
    %c0_i32_1 = arith.constant 0 : i32
    return %c0_i32, %c0_i32_0 : i32, i32
  }
  func.func @transform_9(%arg0: i32, %arg1: i32, %arg2: memref<2xi32, #tpu.memory_space<smem>>, %arg3: memref<2xi32, #tpu.memory_space<smem>>) -> (i32, i32) {
    %c0_i32 = arith.constant 0 : i32
    %c0_i32_0 = arith.constant 0 : i32
    %c0_i32_1 = arith.constant 0 : i32
    return %c0_i32, %c0_i32_0 : i32, i32
  }
  func.func @transform_10(%arg0: i32, %arg1: i32, %arg2: memref<2xi32, #tpu.memory_space<smem>>, %arg3: memref<2xi32, #tpu.memory_space<smem>>) -> (i32, i32) {
    %c0_i32 = arith.constant 0 : i32
    %c0_i32_0 = arith.constant 0 : i32
    %c0_i32_1 = arith.constant 0 : i32
    return %c0_i32, %c0_i32_0 : i32, i32
  }
  func.func @transform_11(%arg0: i32, %arg1: i32, %arg2: memref<2xi32, #tpu.memory_space<smem>>, %arg3: memref<2xi32, #tpu.memory_space<smem>>) -> (i32, i32) {
    %c0_i32 = arith.constant 0 : i32
    %c0_i32_0 = arith.constant 0 : i32
    %c0_i32_1 = arith.constant 0 : i32
    return %c0_i32, %c0_i32_0 : i32, i32
  }
  func.func @transform_12(%arg0: i32, %arg1: i32, %arg2: memref<2xi32, #tpu.memory_space<smem>>, %arg3: memref<2xi32, #tpu.memory_space<smem>>) -> (i32, i32) {
    %c0_i32 = arith.constant 0 : i32
    %c0_i32_0 = arith.constant 0 : i32
    %c0_i32_1 = arith.constant 0 : i32
    return %c0_i32, %c0_i32_0 : i32, i32
  }
  func.func @transform_13(%arg0: i32, %arg1: i32, %arg2: memref<2xi32, #tpu.memory_space<smem>>, %arg3: memref<2xi32, #tpu.memory_space<smem>>) -> (i32, i32) {
    %c0_i32 = arith.constant 0 : i32
    %c0_i32_0 = arith.constant 0 : i32
    %c0_i32_1 = arith.constant 0 : i32
    return %c0_i32, %c0_i32_0 : i32, i32
  }
  func.func @transform_14(%arg0: i32, %arg1: i32, %arg2: memref<2xi32, #tpu.memory_space<smem>>, %arg3: memref<2xi32, #tpu.memory_space<smem>>) -> (i32, i32) {
    %c0_i32 = arith.constant 0 : i32
    %c0_i32_0 = arith.constant 0 : i32
    %c0_i32_1 = arith.constant 0 : i32
    return %c0_i32, %c0_i32_0 : i32, i32
  }
  func.func @transform_15(%arg0: i32, %arg1: i32, %arg2: memref<2xi32, #tpu.memory_space<smem>>, %arg3: memref<2xi32, #tpu.memory_space<smem>>) -> (i32, i32) {
    %c0_i32 = arith.constant 0 : i32
    %c0_i32_0 = arith.constant 0 : i32
    %c0_i32_1 = arith.constant 0 : i32
    return %c0_i32, %c0_i32_0 : i32, i32
  }
  func.func @transform_16(%arg0: i32, %arg1: i32, %arg2: memref<2xi32, #tpu.memory_space<smem>>, %arg3: memref<2xi32, #tpu.memory_space<smem>>) -> (i32, i32) {
    %c0_i32 = arith.constant 0 : i32
    %c0_i32_0 = arith.constant 0 : i32
    %c0_i32_1 = arith.constant 0 : i32
    return %c0_i32, %c0_i32_0 : i32, i32
  }
  func.func @transform_17(%arg0: i32, %arg1: i32, %arg2: memref<2xi32, #tpu.memory_space<smem>>, %arg3: memref<2xi32, #tpu.memory_space<smem>>) -> (i32, i32) {
    %c0_i32 = arith.constant 0 : i32
    %c0_i32_0 = arith.constant 0 : i32
    %c0_i32_1 = arith.constant 0 : i32
    return %c0_i32, %c0_i32_0 : i32, i32
  }
  func.func @transform_18(%arg0: i32, %arg1: i32, %arg2: memref<2xi32, #tpu.memory_space<smem>>, %arg3: memref<2xi32, #tpu.memory_space<smem>>) -> (i32, i32) {
    %c0_i32 = arith.constant 0 : i32
    %c0_i32_0 = arith.constant 0 : i32
    %c0_i32_1 = arith.constant 0 : i32
    return %c0_i32, %c0_i32_0 : i32, i32
  }
  func.func @transform_19(%arg0: i32, %arg1: i32, %arg2: memref<2xi32, #tpu.memory_space<smem>>, %arg3: memref<2xi32, #tpu.memory_space<smem>>) -> (i32, i32) {
    %c0_i32 = arith.constant 0 : i32
    %c0_i32_0 = arith.constant 0 : i32
    %c0_i32_1 = arith.constant 0 : i32
    return %c0_i32, %c0_i32_0 : i32, i32
  }
  func.func @transform_20(%arg0: i32, %arg1: i32, %arg2: memref<2xi32, #tpu.memory_space<smem>>, %arg3: memref<2xi32, #tpu.memory_space<smem>>) -> (i32, i32) {
    %c0_i32 = arith.constant 0 : i32
    %c0_i32_0 = arith.constant 0 : i32
    %c0_i32_1 = arith.constant 0 : i32
    return %c0_i32, %c0_i32_0 : i32, i32
  }
  func.func @transform_21(%arg0: i32, %arg1: i32, %arg2: memref<2xi32, #tpu.memory_space<smem>>, %arg3: memref<2xi32, #tpu.memory_space<smem>>) -> (i32, i32) {
    %c0_i32 = arith.constant 0 : i32
    %c0_i32_0 = arith.constant 0 : i32
    %c0_i32_1 = arith.constant 0 : i32
    return %c0_i32, %c0_i32_0 : i32, i32
  }
  func.func @transform_22(%arg0: i32, %arg1: i32, %arg2: memref<2xi32, #tpu.memory_space<smem>>, %arg3: memref<2xi32, #tpu.memory_space<smem>>) -> (i32, i32) {
    %c0_i32 = arith.constant 0 : i32
    %c0_i32_0 = arith.constant 0 : i32
    %c0_i32_1 = arith.constant 0 : i32
    return %c0_i32, %c0_i32_0 : i32, i32
  }
  func.func @transform_23(%arg0: i32, %arg1: i32, %arg2: memref<2xi32, #tpu.memory_space<smem>>, %arg3: memref<2xi32, #tpu.memory_space<smem>>) -> (i32, i32) {
    %c0_i32 = arith.constant 0 : i32
    %c0_i32_0 = arith.constant 0 : i32
    %c0_i32_1 = arith.constant 0 : i32
    return %c0_i32, %c0_i32_0 : i32, i32
  }
  func.func @transform_24(%arg0: i32, %arg1: i32, %arg2: memref<2xi32, #tpu.memory_space<smem>>, %arg3: memref<2xi32, #tpu.memory_space<smem>>) -> (i32, i32) {
    %c0_i32 = arith.constant 0 : i32
    %c0_i32_0 = arith.constant 0 : i32
    %c0_i32_1 = arith.constant 0 : i32
    return %c0_i32, %c0_i32_0 : i32, i32
  }
  func.func @transform_25(%arg0: i32, %arg1: i32, %arg2: memref<2xi32, #tpu.memory_space<smem>>, %arg3: memref<2xi32, #tpu.memory_space<smem>>) -> (i32, i32) {
    %c0_i32 = arith.constant 0 : i32
    %c0_i32_0 = arith.constant 0 : i32
    %c0_i32_1 = arith.constant 0 : i32
    return %c0_i32, %c0_i32_0 : i32, i32
  }
  func.func @transform_26(%arg0: i32, %arg1: i32, %arg2: memref<2xi32, #tpu.memory_space<smem>>, %arg3: memref<2xi32, #tpu.memory_space<smem>>) -> (i32, i32) {
    %c0_i32 = arith.constant 0 : i32
    %c0_i32_0 = arith.constant 0 : i32
    %c0_i32_1 = arith.constant 0 : i32
    return %c0_i32, %c0_i32_0 : i32, i32
  }
  func.func @transform_27(%arg0: i32, %arg1: i32, %arg2: memref<2xi32, #tpu.memory_space<smem>>, %arg3: memref<2xi32, #tpu.memory_space<smem>>) -> (i32, i32) {
    %c0_i32 = arith.constant 0 : i32
    %c0_i32_0 = arith.constant 0 : i32
    %c0_i32_1 = arith.constant 0 : i32
    return %c0_i32, %c0_i32_0 : i32, i32
  }
  func.func @transform_28(%arg0: i32, %arg1: i32, %arg2: memref<2xi32, #tpu.memory_space<smem>>, %arg3: memref<2xi32, #tpu.memory_space<smem>>) -> (i32, i32) {
    %c0_i32 = arith.constant 0 : i32
    %c0_i32_0 = arith.constant 0 : i32
    %c0_i32_1 = arith.constant 0 : i32
    return %c0_i32, %c0_i32_0 : i32, i32
  }
  func.func @transform_29(%arg0: i32, %arg1: i32, %arg2: memref<2xi32, #tpu.memory_space<smem>>, %arg3: memref<2xi32, #tpu.memory_space<smem>>) -> (i32, i32, i32) {
    %c0_i32 = arith.constant 0 : i32
    %c0_i32_0 = arith.constant 0 : i32
    return %arg0, %arg1, %c0_i32 : i32, i32, i32
  }
}

</mosaic_0001>

<bundles_post_ra>
// kernel: tpu_custom_call.1
= control target key start
LH: loop header
LB: loop body
LE: loop exit
PB: predicated region body
PF: predicated region fallthrough
CT: control target
= control target key end

     0   :  { %s4012_s6 = smov 2   ;;  %s4013_s10 = smov 3   ;;  %s4844_s0 = inlined_call_operand.smem [shape: u32[32], index: -1, kind: input, shape index: {}] }
   0x1   :  { %s4080_s5 = sld [smem:[%s4844_s0]]   ;;  %s4014_s14 = smov 4  }
   0x2   :  { %s4085_s9 = sld [smem:[%s4844_s0 + %s4012_s6]]   ;;  %s4015_s18 = smov 5  }
   0x3   :  { %s4090_s13 = sld [smem:[%s4844_s0 + %s4013_s10]]   ;;  %s4016_s22 = smov 6  }
   0x4   :  { %s4095_s17 = sld [smem:[%s4844_s0 + %s4014_s14]]   ;;  %s4017_s26 = smov 7  }
   0x5   :  { %s4100_s21 = sld [smem:[%s4844_s0 + %s4015_s18]]   ;;  %s4018_s30 = smov 8  }
   0x6   :  { %s4105_s25 = sld [smem:[%s4844_s0 + %s4016_s22]]   ;;  %s4019_s4 = smov 9  }
   0x7   :  { %s4110_s29 = sld [smem:[%s4844_s0 + %s4017_s26]]   ;;  %s4020_s10 = smov 10  }
   0x8   :  { %4876 = sst [smem:[#allocation44_spill]] %s4085_s9  ;;  %s4021_s15 = smov 11  }
   0x9   :  { %4877 = sst [smem:[#allocation45_spill]] %s4090_s13  ;;  %s4022_s20 = smov 12  }
   0xa   :  { %4878 = sst [smem:[#allocation46_spill]] %s4095_s17  ;;  %s4023_s26 = smov 13  }
   0xb   :  { %4879 = sst [smem:[#allocation47_spill]] %s4100_s21  ;;  %s4024_s1 = smov 14  }
   0xc   :  { %4880 = sst [smem:[#allocation48_spill]] %s4105_s25  ;;  %s4025_s7 = smov 15  }
   0xd   :  { %s4115_s3 = sld [smem:[%s4844_s0 + %s4018_s30]]   ;;  %s4027_s22 = smov 17  }
   0xe   :  { %s4120_s8 = sld [smem:[%s4844_s0 + %s4019_s4]]   ;;  %s4028_s28 = smov 18  }
   0xf   :  { %s4125_s14 = sld [smem:[%s4844_s0 + %s4020_s10]]   ;;  %s4040_s2 = smov 30  }
  0x10   :  { %s4130_s19 = sld [smem:[%s4844_s0 + %s4021_s15]]   ;;  %s4026_s15 = smov 16  }
  0x11   :  { %s4135_s24 = sld [smem:[%s4844_s0 + %s4022_s20]]   ;;  %s4041_s11 = smov 31  }
  0x12   :  { %s4140_s30 = sld [smem:[%s4844_s0 + %s4023_s26]]   ;;  %s3388_s13 = scalar_lea.vmem %s4080_s5, 1 }
  0x13   :  { %4881 = sst [smem:[#allocation49_spill]] %s4115_s3 }
  0x14   :  { %4882 = sst [smem:[#allocation50_spill]] %s4120_s8 }
  0x15   :  { %4883 = sst [smem:[#allocation51_spill]] %s4125_s14 }
  0x16   :  { %4884 = sst [smem:[#allocation52_spill]] %s4130_s19 }
  0x17   :  { %4885 = sst [smem:[#allocation53_spill]] %s4135_s24 }
  0x18   :  { %4886 = sst [smem:[#allocation54_spill]] %s4140_s30 }
  0x19   :  { %s4145_s6 = sld [smem:[%s4844_s0 + %s4024_s1]]  }
  0x1a   :  { %s4150_s12 = sld [smem:[%s4844_s0 + %s4025_s7]]   ;;  %s4029_s7 = smov 19  }
  0x1b   :  { %s4155_s20 = sld [smem:[%s4844_s0 + %s4026_s15]]   ;;  %s4030_s15 = smov 20  }
  0x1c   :  { %s4160_s27 = sld [smem:[%s4844_s0 + %s4027_s22]]   ;;  %s4031_s22 = smov 21  }
  0x1d   :  { %s4165_s4 = sld [smem:[%s4844_s0 + %s4028_s28]]   ;;  %s4032_s28 = smov 22  }
  0x1e   :  { %s4170_s24 = sld [smem:[%s4844_s0 + %s4029_s7]]   ;;  %s4033_s7 = smov 23  }
  0x1f   :  { %4887 = sst [smem:[#allocation55_spill]] %s4145_s6  ;;  %s4037_s6 = smov 27  }
  0x20   :  { %4888 = sst [smem:[#allocation56_spill]] %s4150_s12 }
  0x21   :  { %4889 = sst [smem:[#allocation57_spill]] %s4155_s20 }
  0x22   :  { %s4175_s20 = sld [smem:[%s4844_s0 + %s4030_s15]]   ;;  %s4034_s15 = smov 24  }
  0x23   :  { %4890 = sst [smem:[#allocation58_spill]] %s4165_s4 }
  0x24   :  { %4891 = sst [smem:[#allocation59_spill]] %s4170_s24 }
  0x25   :  { %s4180_s25 = sld [smem:[%s4844_s0 + %s4031_s22]]   ;;  %s4035_s22 = smov 25  }
  0x26   :  { %s4185_s10 = sld [smem:[%s4844_s0 + %s4032_s28]]   ;;  %s4036_s28 = smov 26  }
  0x27   :  { %s4190_s16 = sld [smem:[%s4844_s0 + %s4033_s7]]  }
  0x28   :  { %4892 = sst [smem:[#allocation60_spill]] %s4175_s20 }
  0x29   :  { %s4195_s23 = sld [smem:[%s4844_s0 + %s4034_s15]]   ;;  %s4038_s15 = smov 28  }
  0x2a   :  { %s4200_s1 = sld [smem:[%s4844_s0 + %s4035_s22]]   ;;  %s4039_s22 = smov 29  }
  0x2b   :  { %4893 = sst [smem:[#allocation61_spill]] %s4180_s25 }
  0x2c   :  { %4894 = sst [smem:[#allocation62_spill]] %s4185_s10 }
  0x2d   :  { %4895 = sst [smem:[#allocation63_spill]] %s4190_s16 }
  0x2e   :  { %s4205_s3 = sld [smem:[%s4844_s0 + %s4036_s28]]   ;;  %s69_s28 = sshll.u32 %s4080_s5, 4  ;;  %s70_s28 = int_to_ptr.vmem [resolvable:$true] %s69_s28 }
  0x2f   :  { %4896 = sst [smem:[#allocation64_spill]] %s4195_s23 }
  0x30   :  { %4897 = sst [smem:[#allocation65_spill]] %s4200_s1 }
  0x31   :  { %s4210_s30 = sld [smem:[%s4844_s0 + %s4037_s6]]  }
  0x32   :  { %s4215_s4 = sld [smem:[%s4844_s0 + %s4038_s15]]   ;;  %s3384_s15 = sshra.s32 %s70_s28, 4  ;;  %s3385_s15 = int_to_ptr.vmem [resolvable:$true] %s3384_s15 }
  0x33   :  { %s4220_s14 = sld [smem:[%s4844_s0 + %s4039_s22]]   ;;  %s3386_s18 = scalar_lea.vmem %s3385_s15, 1 }
  0x34   :  { %4898 = sst [smem:[#allocation66_spill]] %s4205_s3  ;;  %p3387_p0 = scmp.ne.s32.totalorder %s3385_s15, %s3386_s18 }
  0x35   :  { %s4226_s6 = sld [smem:[%s4844_s0 + %s4040_s2]]   ;;  %p3389_p1 = scmp.lt.s32.totalorder %s3385_s15, %s4080_s5 }
  0x36   :  { %s4231_s9 = sld [smem:[%s4844_s0 + %s4041_s11]]   ;;  %p3390_p2 = scmp.lt.s32.totalorder %s3388_s13, %s3386_s18 }
  0x37   :  { %4899 = sst [smem:[#allocation67_spill]] %s4210_s30 }
  0x38   :  { %4900 = sst [smem:[#allocation68_spill]] %s4215_s4  ;;  %p3391_p3 = por %p3390_p2, %p3389_p1 }
  0x39   :  { %4901 = sst [smem:[#allocation69_spill]] %s4220_s14 }
  0x3a   :  { %p3392_p4 = pnand %p3391_p3, %p3387_p0 }
  0x3b   :  { %4902 = sst [smem:[#allocation70_spill]] %s4226_s6 }
  0x3c   :  { %4903 = sst [smem:[#allocation71_spill]] %s4231_s9 }
  0x3d   :  { %3395 = shalt.err (!%p3392_p4)  }
  0x3e   :  { %s4042_s17 = smov [#allocation7]   ;;  %s4043_s22 = smov 1  }
  0x3f   :  { %72 = dma.vmem_to_smem %s70_s28, 16, %s4042_s17, [#allocation6] }
  0x40   :  { %s2727_s7 = sld [smem:[%s4844_s0 + %s4043_s22]]  }
  0x46   :  { %s74_s3 = sshll.u32 %s2727_s7, 4  ;;  %s3400_s9 = scalar_lea.hbm %s2727_s7, 1  ;;  %s75_s3 = int_to_ptr.hbm [resolvable:$true] %s74_s3 }
  0x47   :  { %s3396_s30 = sshra.s32 %s75_s3, 4  ;;  %s3397_s30 = int_to_ptr.hbm [resolvable:$true] %s3396_s30 }
  0x48   :  { %s3398_s11 = scalar_lea.hbm %s3397_s30, 1  ;;  %p3401_p6 = scmp.lt.s32.totalorder %s3397_s30, %s2727_s7 }
  0x49   :  { %p3399_p5 = scmp.ne.s32.totalorder %s3397_s30, %s3398_s11  ;;  %p3402_p7 = scmp.lt.s32.totalorder %s3400_s9, %s3398_s11 }
  0x4b   :  { %p3403_p8 = por %p3402_p7, %p3401_p6 }
  0x4d   :  { %p3404_p9 = pnand %p3403_p8, %p3399_p5 }
  0x4f   :  { %3407 = shalt.err (!%p3404_p9)  }
  0x50   :  { %s4044_s5 = smov [#allocation8]  }
  0x51   :  { %77 = dma.hbm_to_smem %s75_s3, 16, %s4044_s5, [#allocation6] }
  0x52   :  { %3930 = dma.done.wait [#allocation6], 32 }
  0x53   :  { %3931 = vsyncadd [#allocation6], 4294967264 }
  0x54   :  { %80 = sfence }
  0x55   :  { %81 = vsyncpa [#allocation10], 0 }
  0x56   :  { %83 = vsyncpa [#allocation10 + $0x1], 0 }
  0x57   :  { %84 = vsyncpa [#allocation13], 0 }
  0x58   :  { %85 = vsyncpa [#allocation16], 0 }
  0x59   :  { %86 = vsyncpa [#allocation19], 0 }
  0x5a   :  { %87 = vsyncpa [#allocation22], 0 }
  0x5b   :  { %88 = vsyncpa [#allocation25], 0 }
  0x5c   :  { %89 = vsyncpa [#allocation28], 0 }
  0x5d   :  { %90 = vsyncpa [#allocation31], 0 }
  0x5e   :  { %91 = vsyncpa [#allocation11], 0 }
  0x5f   :  { %93 = vsyncpa [#allocation11 + $0x1], 0  ;;  %s4238_s0 = smov 0   ;;  %s4240_s28 = smov 0  }
  0x60   :  { %s4242_s9 = smov 0   ;;  %s4244_s15 = smov 0  }
  0x61   :  { %s4246_s18 = smov 0   ;;  %s4248_s13 = smov 0  }
  0x62   :  { %s4250_s17 = smov 0   ;;  %s4252_s22 = smov 0  }
  0x63   :  { %s4254_s26 = smov 0   ;;  %s4256_s2 = smov 0  }
  0x64   :  { %s4258_s7 = smov 0  }
  0x65 LB: > { %s4904_s25 = sld [smem:[#allocation61_spill]]  ;;  %s4849_s3 = sadd.s32 4294967295, %s4010_s7   ;;  %s4010_s7 = sphi %s4258_s7, %s99_s7   ;;  %s4006_s2 = sphi %s4256_s2, %s4977_s2   ;;  %s4002_s26 = sphi %s4254_s26, %s4976_s26   ;;  %s3998_s22 = sphi %s4252_s22, %s4975_s22   ;;  %s3994_s17 = sphi %s4250_s17, %s4974_s17   ;;  %s3990_s13 = sphi %s4248_s13, %s4973_s13   ;;  %s3986_s18 = sphi %s4246_s18, %s4972_s18   ;;  %s3982_s15 = sphi %s4244_s15, %s4971_s15   ;;  %s3978_s9 = sphi %s4242_s9, %s4970_s9   ;;  %s3974_s28 = sphi %s4240_s28, %s4968_s28   ;;  %s3970_s0 = sphi %s4238_s0, %s4967_s0  }
  0x66   : > { %s4905_s24 = sld [smem:[#allocation59_spill]]  ;;  %p2760_p10 = scmp.ge.s32.totalorder %s4010_s7, 1 }
  0x67   : > { %s4906_s23 = sld [smem:[#allocation64_spill]]  ;;  %p4297_p11 = scmp.eq.s32.totalorder %s4849_s3, 0 }
  0x68   : > { %s4907_s20 = sld [smem:[#allocation60_spill]]  ;;  %p770_p12 = scmp.lt.s32.totalorder %s4010_s7, 5 }
  0x69   : > { %s4908_s19 = sld [smem:[#allocation52_spill]]  ;;  %s4045_s4 = smov [#allocation12]  }
  0x6a   : > { %s4909_s16 = sld [smem:[#allocation63_spill]]  ;;  %p4303_p13 = pnand %p2760_p10, %p770_p12 }
  0x6b   : > { %s4910_s12 = sld [smem:[#allocation56_spill]]  ;;  %s783_s6 = sshll.u32 %s4045_s4, 4  ;;  %s784_s6 = int_to_ptr.vmem [resolvable:$true] %s783_s6 }
  0x6c   : > { %s4911_s10 = sld [smem:[#allocation62_spill]]  ;;  %p3095_p0 = pneg %p4303_p13 }
  0x6d   : > { %s4912_s8 = sld [smem:[#allocation50_spill]] }
  0x6e   : > { %s4913_s1 = sld [smem:[#allocation65_spill]]  ;;  %p4311_p1 = pnand %p3095_p0, %p4297_p11 }
  0x6f   : > { %s4914_s21 = sld [smem:[#allocation47_spill]] }
  0x70   : > { %4915 = sst [smem:[#allocation72_spill]] %s3970_s0  ;;  %p4320_p3 = pneg %p4311_p1 }
  0x71   : > { %4916 = sst [smem:[#allocation73_spill]] %s3974_s28 }
  0x72   : > { %4917 = sst [smem:[#allocation74_spill]] %s3978_s9 }
  0x73   : > { %4918 = sst [smem:[#allocation75_spill]] %s3994_s17  ;;  %s815_s14 = sshll.u32 %s4912_s8, 4  ;;  %s4316_s14 = int_to_ptr.hbm [resolvable:$true] %s815_s14 }
  0x74   : > { %4919 = sst [smem:[#allocation76_spill]] %s3998_s22 }
  0x75   : > { %s4920_s30 = scalar_select %p4297_p11, 1, 0 }
  0x76   : > { %s781_s11 = sshll.u32 %s4914_s21, 4  ;;  %s3415_s4 = scalar_lea.hbm %s4914_s21, 16  ;;  %s782_s11 = int_to_ptr.hbm [resolvable:$true] %s781_s11 }
  0x77   : > { %4921 = sst [smem:[#allocation77_spill]] %s4920_s30  ;;  %s3408_s17 = sshra.s32 %s782_s11, 4  ;;  %s3409_s17 = int_to_ptr.hbm [resolvable:$true] %s3408_s17 }
  0x78   : > { %s4922_s5 = scalar_select %p4303_p13, 1, 0 }
  0x79   : > { %s3410_s22 = scalar_lea.hbm %s3409_s17, 16  ;;  %p3416_p6 = scmp.lt.s32.totalorder %s3409_s17, %s4914_s21 }
  0x7a   : > { %4923 = sst [smem:[#allocation78_spill]] %s4922_s5  ;;  %p3411_p2 = scmp.ne.s32.totalorder %s3409_s17, %s3410_s22 }
  0x7b   : > { %p3417_p7 = scmp.lt.s32.totalorder %s3415_s4, %s3410_s22 }
  0x7c   : > { %p3413_p4 = pnand %p4320_p3, %p3411_p2 }
  0x7d   : > { %p3418_p8 = por %p3417_p7, %p3416_p6 }
  0x7e   : > { %p3414_p5 = pneg %p3413_p4 }
  0x80   : > { %p3419_p9 = pnand %p3418_p8, %p3414_p5 }
  0x82   : > { %3422 = shalt.err (!%p3419_p9)
}
  0x83   : > { %s4860_s0 = smov 64   ;;  %s4861_s28 = smov 4  }
  0x84   : > { %3098 = dma.hbm_to_vmem [thread:$0]  (!%p4311_p1), %s782_s11, 256, %s784_s6, [#allocation13], %s4860_s0, %s4860_s0, %s4861_s28  }
  0x85   : > { %s4048_s9 = smov [#allocation15]   ;;  %s855_s17 = sshll.u32 %s4910_s12, 4  ;;  %s4334_s17 = int_to_ptr.hbm [resolvable:$true] %s855_s17 }
  0x86   : > { %s817_s30 = sshll.u32 %s4048_s9, 4  ;;  %s3438_s22 = sshra.s32 %s4316_s14, 4  ;;  %s818_s30 = int_to_ptr.vmem [resolvable:$true] %s817_s30  ;;  %s3439_s22 = int_to_ptr.hbm [resolvable:$true] %s3438_s22 }
  0x87   : > { %s3440_s4 = scalar_lea.hbm %s3439_s22, 16  ;;  %s3445_s21 = scalar_lea.hbm %s4912_s8, 16 }
  0x88   : > { %p3441_p10 = scmp.ne.s32.totalorder %s3439_s22, %s3440_s4  ;;  %p3446_p2 = scmp.lt.s32.totalorder %s3439_s22, %s4912_s8 }
  0x89   : > { %p3447_p4 = scmp.lt.s32.totalorder %s3445_s21, %s3440_s4 }
  0x8a   : > { %p3443_p12 = pnand %p3441_p10, %p4320_p3 }
  0x8b   : > { %p3448_p5 = por %p3447_p4, %p3446_p2 }
  0x8c   : > { %p3444_p0 = pneg %p3443_p12 }
  0x8e   : > { %p3449_p6 = pnand %p3448_p5, %p3444_p0 }
  0x90   : > { %3452 = shalt.err (!%p3449_p6)
}
  0x91   : > { %3104 = dma.hbm_to_vmem [thread:$0]  (!%p4311_p1), %s4316_s14, 256, %s818_s30, [#allocation16], %s4860_s0, %s4860_s0, %s4861_s28  }
  0x92   : > { %s889_s6 = sshll.u32 %s4905_s24, 4  ;;  %s4049_s9 = smov [#allocation18]   ;;  %s4348_s6 = int_to_ptr.hbm [resolvable:$true] %s889_s6 }
  0x93   : > { %s857_s11 = sshll.u32 %s4049_s9, 4  ;;  %s3468_s21 = sshra.s32 %s4334_s17, 4  ;;  %s858_s11 = int_to_ptr.vmem [resolvable:$true] %s857_s11  ;;  %s3469_s21 = int_to_ptr.hbm [resolvable:$true] %s3468_s21 }
  0x94   : > { %s3470_s22 = scalar_lea.hbm %s3469_s21, 16  ;;  %s3475_s4 = scalar_lea.hbm %s4910_s12, 16 }
  0x95   : > { %p3471_p7 = scmp.ne.s32.totalorder %s3469_s21, %s3470_s22  ;;  %p3476_p10 = scmp.lt.s32.totalorder %s3469_s21, %s4910_s12 }
  0x96   : > { %p3477_p12 = scmp.lt.s32.totalorder %s3475_s4, %s3470_s22 }
  0x97   : > { %p3473_p8 = pnand %p3471_p7, %p4320_p3 }
  0x98   : > { %p3478_p0 = por %p3477_p12, %p3476_p10 }
  0x99   : > { %p3474_p9 = pneg %p3473_p8 }
  0x9b   : > { %p3479_p2 = pnand %p3478_p0, %p3474_p9 }
  0x9d   : > { %3482 = shalt.err (!%p3479_p2)
}
  0x9e   : > { %3110 = dma.hbm_to_vmem [thread:$0]  (!%p4311_p1), %s4334_s17, 256, %s858_s11, [#allocation19], %s4860_s0, %s4860_s0, %s4861_s28  }
  0x9f   : > { %s4050_s14 = smov [#allocation21]   ;;  %s915_s9 = sshll.u32 %s4904_s25, 4  ;;  %s4362_s9 = int_to_ptr.hbm [resolvable:$true] %s915_s9 }
  0xa0   : > { %s891_s30 = sshll.u32 %s4050_s14, 4  ;;  %s3498_s21 = sshra.s32 %s4348_s6, 4  ;;  %s892_s30 = int_to_ptr.vmem [resolvable:$true] %s891_s30  ;;  %s3499_s21 = int_to_ptr.hbm [resolvable:$true] %s3498_s21 }
  0xa1   : > { %s3500_s22 = scalar_lea.hbm %s3499_s21, 16  ;;  %s3505_s4 = scalar_lea.hbm %s4905_s24, 16 }
  0xa2   : > { %p3501_p4 = scmp.ne.s32.totalorder %s3499_s21, %s3500_s22  ;;  %p3506_p7 = scmp.lt.s32.totalorder %s3499_s21, %s4905_s24 }
  0xa3   : > { %p3507_p8 = scmp.lt.s32.totalorder %s3505_s4, %s3500_s22 }
  0xa4   : > { %p3503_p5 = pnand %p3501_p4, %p4320_p3 }
  0xa5   : > { %p3508_p9 = por %p3507_p8, %p3506_p7 }
  0xa6   : > { %p3504_p6 = pneg %p3503_p5 }
  0xa8   : > { %p3509_p10 = pnand %p3508_p9, %p3504_p6 }
  0xaa   : > { %3512 = shalt.err (!%p3509_p10)
}
  0xab   : > { %3116 = dma.hbm_to_vmem [thread:$0]  (!%p4311_p1), %s4348_s6, 256, %s892_s30, [#allocation22], %s4860_s0, %s4860_s0, %s4861_s28  }
  0xac   : > { %s942_s17 = sshll.u32 %s4909_s16, 4  ;;  %s4051_s11 = smov [#allocation24]   ;;  %s4376_s17 = int_to_ptr.hbm [resolvable:$true] %s942_s17 }
  0xad   : > { %s917_s14 = sshll.u32 %s4051_s11, 4  ;;  %s3528_s21 = sshra.s32 %s4362_s9, 4  ;;  %s918_s14 = int_to_ptr.vmem [resolvable:$true] %s917_s14  ;;  %s3529_s21 = int_to_ptr.hbm [resolvable:$true] %s3528_s21 }
  0xae   : > { %s3530_s22 = scalar_lea.hbm %s3529_s21, 16  ;;  %s3535_s4 = scalar_lea.hbm %s4904_s25, 16 }
  0xaf   : > { %p3531_p12 = scmp.ne.s32.totalorder %s3529_s21, %s3530_s22  ;;  %p3536_p4 = scmp.lt.s32.totalorder %s3529_s21, %s4904_s25 }
  0xb0   : > { %p3537_p5 = scmp.lt.s32.totalorder %s3535_s4, %s3530_s22 }
  0xb1   : > { %p3533_p0 = pnand %p3531_p12, %p4320_p3 }
  0xb2   : > { %p3538_p6 = por %p3537_p5, %p3536_p4 }
  0xb3   : > { %p3534_p2 = pneg %p3533_p0 }
  0xb5   : > { %p3539_p7 = pnand %p3538_p6, %p3534_p2 }
  0xb7   : > { %3542 = shalt.err (!%p3539_p7)
}
  0xb8   : > { %3122 = dma.hbm_to_vmem [thread:$0]  (!%p4311_p1), %s4362_s9, 256, %s918_s14, [#allocation25], %s4860_s0, %s4860_s0, %s4861_s28  }
  0xb9   : > { %s4052_s6 = smov [#allocation27]   ;;  %s965_s11 = sshll.u32 %s4913_s1, 4  ;;  %s4390_s11 = int_to_ptr.hbm [resolvable:$true] %s965_s11 }
  0xba   : > { %s944_s30 = sshll.u32 %s4052_s6, 4  ;;  %s3558_s21 = sshra.s32 %s4376_s17, 4  ;;  %s945_s30 = int_to_ptr.vmem [resolvable:$true] %s944_s30  ;;  %s3559_s21 = int_to_ptr.hbm [resolvable:$true] %s3558_s21 }
  0xbb   : > { %s3560_s22 = scalar_lea.hbm %s3559_s21, 1  ;;  %s3565_s4 = scalar_lea.hbm %s4909_s16, 1 }
  0xbc   : > { %p3561_p8 = scmp.ne.s32.totalorder %s3559_s21, %s3560_s22  ;;  %p3566_p12 = scmp.lt.s32.totalorder %s3559_s21, %s4909_s16 }
  0xbd   : > { %p3567_p0 = scmp.lt.s32.totalorder %s3565_s4, %s3560_s22 }
  0xbe   : > { %p3563_p9 = pnand %p3561_p8, %p4320_p3 }
  0xbf   : > { %p3568_p2 = por %p3567_p0, %p3566_p12 }
  0xc0   : > { %p3564_p10 = pneg %p3563_p9 }
  0xc2   : > { %p3569_p4 = pnand %p3568_p2, %p3564_p10 }
  0xc4   : > { %3572 = shalt.err (!%p3569_p4)
}
  0xc5   : > { %3128 = dma.hbm_to_vmem [thread:$0]  (!%p4311_p1), %s4376_s17, 16, %s945_s30, [#allocation28]  }
  0xc6   : > { %s798_s9 = sshll.u32 %s4110_s29, 4  ;;  %s4053_s14 = smov [#allocation30]   ;;  %s4401_s9 = int_to_ptr.hbm [resolvable:$true] %s798_s9 }
  0xc7   : > { %s967_s6 = sshll.u32 %s4053_s14, 4  ;;  %s3588_s21 = sshra.s32 %s4390_s11, 4  ;;  %s968_s6 = int_to_ptr.vmem [resolvable:$true] %s967_s6  ;;  %s3589_s21 = int_to_ptr.hbm [resolvable:$true] %s3588_s21 }
  0xc8   : > { %s3590_s22 = scalar_lea.hbm %s3589_s21, 16  ;;  %s3595_s4 = scalar_lea.hbm %s4913_s1, 16 }
  0xc9   : > { %p3591_p5 = scmp.ne.s32.totalorder %s3589_s21, %s3590_s22  ;;  %p3596_p8 = scmp.lt.s32.totalorder %s3589_s21, %s4913_s1 }
  0xca   : > { %p3597_p9 = scmp.lt.s32.totalorder %s3595_s4, %s3590_s22 }
  0xcb   : > { %p3593_p6 = pnand %p3591_p5, %p4320_p3 }
  0xcc   : > { %p3598_p10 = por %p3597_p9, %p3596_p8 }
  0xcd   : > { %p3594_p7 = pneg %p3593_p6 }
  0xcf   : > { %p3599_p12 = pnand %p3598_p10, %p3594_p7 }
  0xd1   : > { %3602 = shalt.err (!%p3599_p12)
}
  0xd2   : > { %3134 = dma.hbm_to_vmem [thread:$0]  (!%p4311_p1), %s4390_s11, 256, %s968_s6, [#allocation31], %s4860_s0, %s4860_s0, %s4861_s28  }
  0xd3   : > { %s4054_s17 = smov [#allocation14]   ;;  %s832_s14 = sshll.u32 %s4908_s19, 4  ;;  %s4415_s14 = int_to_ptr.hbm [resolvable:$true] %s832_s14 }
  0xd4   : > { %s800_s30 = sshll.u32 %s4054_s17, 4  ;;  %s3618_s21 = sshra.s32 %s4401_s9, 4  ;;  %s801_s30 = int_to_ptr.vmem [resolvable:$true] %s800_s30  ;;  %s3619_s21 = int_to_ptr.hbm [resolvable:$true] %s3618_s21 }
  0xd5   : > { %s3620_s22 = scalar_lea.hbm %s3619_s21, 16  ;;  %s3625_s4 = scalar_lea.hbm %s4110_s29, 16 }
  0xd6   : > { %p3621_p0 = scmp.ne.s32.totalorder %s3619_s21, %s3620_s22  ;;  %p3626_p5 = scmp.lt.s32.totalorder %s3619_s21, %s4110_s29 }
  0xd7   : > { %p3627_p6 = scmp.lt.s32.totalorder %s3625_s4, %s3620_s22 }
  0xd8   : > { %p3623_p2 = pnand %p3621_p0, %p4320_p3 }
  0xd9   : > { %p3628_p7 = por %p3627_p6, %p3626_p5 }
  0xda   : > { %p3624_p4 = pneg %p3623_p2 }
  0xdc   : > { %p3629_p8 = pnand %p3628_p7, %p3624_p4 }
  0xde   : > { %3632 = shalt.err (!%p3629_p8)
}
  0xdf   : > { %3101 = dma.hbm_to_vmem [thread:$0]  (!%p4311_p1), %s4401_s9, 256, %s801_s30, [#allocation13], %s4860_s0, %s4860_s0, %s4861_s28  }
  0xe0   : > { %s872_s11 = sshll.u32 %s4160_s27, 4  ;;  %s4055_s6 = smov [#allocation17]   ;;  %s4429_s11 = int_to_ptr.hbm [resolvable:$true] %s872_s11 }
  0xe1   : > { %s834_s17 = sshll.u32 %s4055_s6, 4  ;;  %s3648_s21 = sshra.s32 %s4415_s14, 4  ;;  %s835_s17 = int_to_ptr.vmem [resolvable:$true] %s834_s17  ;;  %s3649_s21 = int_to_ptr.hbm [resolvable:$true] %s3648_s21 }
  0xe2   : > { %s3650_s22 = scalar_lea.hbm %s3649_s21, 16  ;;  %s3655_s4 = scalar_lea.hbm %s4908_s19, 16 }
  0xe3   : > { %p3651_p9 = scmp.ne.s32.totalorder %s3649_s21, %s3650_s22  ;;  %p3656_p0 = scmp.lt.s32.totalorder %s3649_s21, %s4908_s19 }
  0xe4   : > { %p3657_p2 = scmp.lt.s32.totalorder %s3655_s4, %s3650_s22 }
  0xe5   : > { %p3653_p10 = pnand %p3651_p9, %p4320_p3 }
  0xe6   : > { %p3658_p4 = por %p3657_p2, %p3656_p0 }
  0xe7   : > { %p3654_p12 = pneg %p3653_p10 }
  0xe9   : > { %p3659_p5 = pnand %p3658_p4, %p3654_p12 }
  0xeb   : > { %3662 = shalt.err (!%p3659_p5)
}
  0xec   : > { %3107 = dma.hbm_to_vmem [thread:$0]  (!%p4311_p1), %s4415_s14, 256, %s835_s17, [#allocation16], %s4860_s0, %s4860_s0, %s4861_s28  }
  0xed   : > { %s4056_s9 = smov [#allocation20]   ;;  %s904_s6 = sshll.u32 %s4907_s20, 4  ;;  %s4443_s6 = int_to_ptr.hbm [resolvable:$true] %s904_s6 }
  0xee   : > { %s874_s30 = sshll.u32 %s4056_s9, 4  ;;  %s3678_s21 = sshra.s32 %s4429_s11, 4  ;;  %s875_s30 = int_to_ptr.vmem [resolvable:$true] %s874_s30  ;;  %s3679_s21 = int_to_ptr.hbm [resolvable:$true] %s3678_s21 }
  0xef   : > { %s3680_s22 = scalar_lea.hbm %s3679_s21, 16  ;;  %s3685_s4 = scalar_lea.hbm %s4160_s27, 16 }
  0xf0   : > { %p3681_p6 = scmp.ne.s32.totalorder %s3679_s21, %s3680_s22  ;;  %p3686_p9 = scmp.lt.s32.totalorder %s3679_s21, %s4160_s27 }
  0xf1   : > { %p3687_p10 = scmp.lt.s32.totalorder %s3685_s4, %s3680_s22 }
  0xf2   : > { %p3683_p7 = pnand %p3681_p6, %p4320_p3 }
  0xf3   : > { %p3688_p12 = por %p3687_p10, %p3686_p9 }
  0xf4   : > { %p3684_p8 = pneg %p3683_p7 }
  0xf6   : > { %p3689_p0 = pnand %p3688_p12, %p3684_p8 }
  0xf8   : > { %3692 = shalt.err (!%p3689_p0)
}
  0xf9   : > { %3113 = dma.hbm_to_vmem [thread:$0]  (!%p4311_p1), %s4429_s11, 256, %s875_s30, [#allocation19], %s4860_s0, %s4860_s0, %s4861_s28  }
  0xfa   : > { %s930_s14 = sshll.u32 %s4911_s10, 4  ;;  %s4057_s17 = smov [#allocation23]   ;;  %s4457_s14 = int_to_ptr.hbm [resolvable:$true] %s930_s14 }
  0xfb   : > { %s906_s9 = sshll.u32 %s4057_s17, 4  ;;  %s3708_s21 = sshra.s32 %s4443_s6, 4  ;;  %s907_s9 = int_to_ptr.vmem [resolvable:$true] %s906_s9  ;;  %s3709_s21 = int_to_ptr.hbm [resolvable:$true] %s3708_s21 }
  0xfc   : > { %s3710_s22 = scalar_lea.hbm %s3709_s21, 1  ;;  %s3715_s4 = scalar_lea.hbm %s4907_s20, 1 }
  0xfd   : > { %p3711_p2 = scmp.ne.s32.totalorder %s3709_s21, %s3710_s22  ;;  %p3716_p6 = scmp.lt.s32.totalorder %s3709_s21, %s4907_s20 }
  0xfe   : > { %p3717_p7 = scmp.lt.s32.totalorder %s3715_s4, %s3710_s22 }
  0xff   : > { %p3713_p4 = pnand %p3711_p2, %p4320_p3 }
 0x100   : > { %p3718_p8 = por %p3717_p7, %p3716_p6 }
 0x101   : > { %p3714_p5 = pneg %p3713_p4 }
 0x103   : > { %p3719_p9 = pnand %p3718_p8, %p3714_p5 }
 0x105   : > { %3722 = shalt.err (!%p3719_p9)
}
 0x106   : > { %3119 = dma.hbm_to_vmem [thread:$0]  (!%p4311_p1), %s4443_s6, 16, %s907_s9, [#allocation22]  }
 0x107   : > { %s4058_s11 = smov [#allocation26]   ;;  %s954_s17 = sshll.u32 %s4906_s23, 4  ;;  %s4468_s17 = int_to_ptr.hbm [resolvable:$true] %s954_s17 }
 0x108   : > { %s932_s30 = sshll.u32 %s4058_s11, 4  ;;  %s3738_s21 = sshra.s32 %s4457_s14, 4  ;;  %s933_s30 = int_to_ptr.vmem [resolvable:$true] %s932_s30  ;;  %s3739_s21 = int_to_ptr.hbm [resolvable:$true] %s3738_s21 }
 0x109   : > { %s3740_s22 = scalar_lea.hbm %s3739_s21, 1  ;;  %s3745_s4 = scalar_lea.hbm %s4911_s10, 1 }
 0x10a   : > { %p3741_p10 = scmp.ne.s32.totalorder %s3739_s21, %s3740_s22  ;;  %p3746_p2 = scmp.lt.s32.totalorder %s3739_s21, %s4911_s10 }
 0x10b   : > { %p3747_p4 = scmp.lt.s32.totalorder %s3745_s4, %s3740_s22 }
 0x10c   : > { %p3743_p12 = pnand %p3741_p10, %p4320_p3 }
 0x10d   : > { %p3748_p5 = por %p3747_p4, %p3746_p2 }
 0x10e   : > { %p3744_p0 = pneg %p3743_p12 }
 0x110   : > { %p3749_p6 = pnand %p3748_p5, %p3744_p0 }
 0x112   : > { %3752 = shalt.err (!%p3749_p6)
}
 0x113   : > { %s4926_s6 = sld [smem:[#allocation66_spill]]  ;;  %s4059_s11 = smov [#allocation29]  }
 0x114   : > { %3125 = dma.hbm_to_vmem [thread:$0]  (!%p4311_p1), %s4457_s14, 16, %s933_s30, [#allocation25]  }
 0x115   : > { %s956_s0 = sshll.u32 %s4059_s11, 4  ;;  %s3768_s21 = sshra.s32 %s4468_s17, 4  ;;  %s957_s0 = int_to_ptr.vmem [resolvable:$true] %s956_s0  ;;  %s3769_s21 = int_to_ptr.hbm [resolvable:$true] %s3768_s21 }
 0x116   : > { %s3770_s22 = scalar_lea.hbm %s3769_s21, 1  ;;  %s3775_s4 = scalar_lea.hbm %s4906_s23, 1 }
 0x117   : > { %p3771_p7 = scmp.ne.s32.totalorder %s3769_s21, %s3770_s22  ;;  %p3776_p10 = scmp.lt.s32.totalorder %s3769_s21, %s4906_s23 }
 0x118   : > { %p3777_p12 = scmp.lt.s32.totalorder %s3775_s4, %s3770_s22 }
 0x119   : > { %s980_s9 = sshll.u32 %s4926_s6, 4  ;;  %p3773_p8 = pnand %p3771_p7, %p4320_p3  ;;  %s4479_s9 = int_to_ptr.hbm [resolvable:$true] %s980_s9 }
 0x11a   : > { %p3778_p0 = por %p3777_p12, %p3776_p10 }
 0x11b   : > { %p3774_p9 = pneg %p3773_p8 }
 0x11d   : > { %p3779_p2 = pnand %p3778_p0, %p3774_p9 }
 0x11f   : > { %3782 = shalt.err (!%p3779_p2)
}
 0x120   : > { %3131 = dma.hbm_to_vmem [thread:$0]  (!%p4311_p1), %s4468_s17, 16, %s957_s0, [#allocation28]  }
 0x121   : > { %s4060_s14 = smov [#allocation32]   ;;  %s3798_s11 = sshra.s32 %s4479_s9, 4  ;;  %s3799_s11 = int_to_ptr.hbm [resolvable:$true] %s3798_s11 }
 0x122   : > { %s982_s30 = sshll.u32 %s4060_s14, 4  ;;  %s3800_s28 = scalar_lea.hbm %s3799_s11, 1  ;;  %s983_s30 = int_to_ptr.vmem [resolvable:$true] %s982_s30 }
 0x123   : > { %p3801_p4 = scmp.ne.s32.totalorder %s3799_s11, %s3800_s28  ;;  %s3805_s21 = scalar_lea.hbm %s4926_s6, 1 }
 0x124   : > { %p3806_p7 = scmp.lt.s32.totalorder %s3799_s11, %s4926_s6  ;;  %p3807_p8 = scmp.lt.s32.totalorder %s3805_s21, %s3800_s28 }
 0x125   : > { %p3803_p5 = pnand %p3801_p4, %p4320_p3 }
 0x126   : > { %p3808_p9 = por %p3807_p8, %p3806_p7 }
 0x127   : > { %p3804_p6 = pneg %p3803_p5 }
 0x129   : > { %p3809_p10 = pnand %p3808_p9, %p3804_p6 }
 0x12b   : > { %3812 = shalt.err (!%p3809_p10)
}
 0x12c   : > { %s4928_s5 = sld [smem:[#allocation74_spill]]  ;;  %s108_s17 = sadd.s32 1, %s4002_s26 }
 0x12d   : > { %3137 = dma.hbm_to_vmem [thread:$0]  (!%p4311_p1), %s4479_s9, 16, %s983_s30, [#allocation31]  }
 0x12e   : > { %s4929_s28 = sld [smem:[#allocation73_spill]]  ;;  %p109_p3 = scmp.ge.s32.totalorder %s108_s17, 2 }
 0x12f   : > { %s111_s3 = sadd.s32 1, %s4006_s2  ;;  %s2759_s22 = sadd.s32 4294967294, %s4010_s7  }
 0x130   : > { %s172_s4 = sadd.s32 1, %s3990_s13  ;;  %s4979_s17 = smov (%p109_p3, %s108_s17), 0 }
 0x131   : > { %s4981_s3 = smov (!%p109_p3, %s111_s3), %s4006_s2  ;;  %p179_p12 = scmp.ne.s32.totalorder %s3990_s13, %s3986_s18 }
 0x132   : > { %p185_p0 = scmp.ne.s32.totalorder %s3986_s18, %s3982_s15  ;;  %s4930_s14 = sld [smem:[#allocation72_spill]] }
 0x133   : > { %p113_p1 = scmp.ge.s32.totalorder %s4981_s3, 2  ;;  %p180_p2 = scmp.eq.s32.totalorder %s4010_s7, 0 }
 0x134   : > { %p4511_p4 = por %p4297_p11, %p185_p0  ;;  %s742_s30 = ssub.s32 %s4002_s26, %s4979_s17 }
 0x135   : > { %s4983_s3 = smov (%p113_p1, %s4981_s3), 0  ;;  %s746_s11 = sadd.s32 1, %s4928_s5 }
 0x136   : > { %p756_p5 = scmp.ne.s32.totalorder %s4928_s5, %s4929_s28  ;;  %s169_s15 = ssub.s32 %s4006_s2, %s4983_s3 }
 0x137   : > { %s4932_s21 = sadd.s32 4294967295, %s4010_s7   ;;  %s4933_s1 = sld [smem:[#allocation46_spill]] }
 0x138   : > { %p757_p6 = scmp.eq.s32.totalorder %s4932_s21, 3  ;;  %p170_p7 = scmp.eq.s32.totalorder %s169_s15, 0 }
 0x139   : > { %s743_s0 = sor.u32 %s742_s30, %s169_s15  ;;  %p762_p10 = scmp.ne.s32.totalorder %s4929_s28, %s4930_s14 }
 0x13a   : > { %p744_p8 = scmp.eq.s32.totalorder %s743_s0, 0  ;;  %p4526_p9 = por %p757_p6, %p756_p5 }
 0x13b   : > { %s4531_s8 = scalar_select %p170_p7, %s3990_s13, %s172_s4  }
 0x13c   : > { %s4985_s5 = smov (!%p744_p8, %s4928_s5), %s746_s11  ;;  %p763_p3 = scmp.eq.s32.totalorder %s2759_s22, 3 }
 0x13d   : > { %p181_p0 = por %p180_p2, %p179_p12  ;;  %s1024_s10 = sand.u32 1, %s3990_s13  }
 0x13e   : > { %p4544_p1 = por %p763_p3, %p762_p10  ;;  %p3160_p11 = scmp.lt.s32.totalorder %s4010_s7, 4 }
 0x13f   : > { %s2776_s30 = sshll.u32 %s1024_s10, 3  ;;  %s2993_s15 = sshll.u32 %s4006_s2, 3 }
 0x140   : > { %s4935_s12 = scalar_select %p4544_p1, 1, 0 }
 0x141   : > { %s1033_s21 = scalar_lea.hbm %s4933_s1, %s2993_s15  ;;  %s1028_s0 = scalar_lea.vmem [#allocation9], %s2776_s30 }
 0x142   : > { %s1034_s4 = sshll.u32 %s1033_s21, 4  ;;  %s1036_s11 = sshll.u32 %s1028_s0, 4  ;;  %s1035_s4 = int_to_ptr.hbm [resolvable:$true] %s1034_s4  ;;  %s1037_s11 = int_to_ptr.vmem [resolvable:$true] %s1036_s11 }
 0x143   : > { %p4551_p5 = pnand %p3160_p11, %p181_p0  ;;  %s1025_s22 = scalar_lea.sflag [#allocation10], %s1024_s10 }
 0x144   : > { %s3828_s14 = sshra.s32 %s1035_s4, 4  ;;  %s3835_s15 = scalar_lea.hbm %s4933_s1, 16  ;;  %s3829_s14 = int_to_ptr.hbm [resolvable:$true] %s3828_s14 }
 0x145   : > { %s3830_s16 = scalar_lea.hbm %s3829_s14, 8  ;;  %p3832_p2 = pneg %p4551_p5 }
 0x146   : > { %p3831_p12 = scmp.ne.s32.totalorder %s3829_s14, %s3830_s16  ;;  %p3836_p8 = scmp.lt.s32.totalorder %s3829_s14, %s4933_s1 }
 0x147   : > { %p3837_p10 = scmp.lt.s32.totalorder %s3835_s15, %s3830_s16 }
 0x148   : > { %p3833_p6 = pnand %p3832_p2, %p3831_p12 }
 0x149   : > { %p3838_p3 = por %p3837_p10, %p3836_p8 }
 0x14a   : > { %p3834_p7 = pneg %p3833_p6 }
 0x14c   : > { %p3839_p1 = pnand %p3838_p3, %p3834_p7 }
 0x14e   : > { %3842 = shalt.err (!%p3839_p1)
}
 0x14f   : > { %s4937_s30 = smov 4   ;;  %s4938_s21 = smov 64  }
 0x150   : > { %3141 = dma.hbm_to_vmem [thread:$0]  (!%p4551_p5), %s1035_s4, 128, %s1037_s11, %s1025_s22, %s4938_s21, %s4938_s21, %s4937_s30  }
 0x151   : > { %1048 = sbr.rel (%p4303_p13) target bundleno = 3607 (0xe17), region = 136  ;;  %s1050_s0 = sand.u32 (!%p4303_p13), 1, %s3986_s18  }
 0x152   : > { %s4567_s19 = sshll.u32 (!%p4303_p13), %s1050_s0, 3  ;;  %s1051_s14 = scalar_lea.sflag (!%p4303_p13), [#allocation10], %s1050_s0 }
 0x156   : > { %3933 = dma.done.wait (%p4511_p4), %s1051_s14, 128  }
 0x157   : > { %3935 = vsyncadd (%p4511_p4), %s1051_s14, 4294967168  ;;  %s4940_s28 = sld [smem:[#allocation77_spill]] }
 0x15d   : > { %p4941_p11 = scmp.ne.s32.totalorder %s4940_s28, 0 }
 0x15f   : > { %3937 = dma.done.wait (%p4941_p11), [#allocation13], 512  }
 0x160   : > { %3939 = vsyncadd (%p4941_p11), [#allocation13], 4294966784 }
 0x161   : > { %3941 = dma.done.wait (%p4941_p11), [#allocation16], 512  }
 0x162   : > { %3943 = vsyncadd (%p4941_p11), [#allocation16], 4294966784 }
 0x163   : > { %3945 = dma.done.wait (%p4941_p11), [#allocation19], 512  }
 0x164   : > { %3947 = vsyncadd (%p4941_p11), [#allocation19], 4294966784 }
 0x165   : > { %3949 = dma.done.wait (%p4941_p11), [#allocation22], 272  }
 0x166   : > { %3951 = vsyncadd (%p4941_p11), [#allocation22], 4294967024 }
 0x167   : > { %3953 = dma.done.wait (%p4941_p11), [#allocation25], 272  }
 0x168   : > { %3955 = vsyncadd (%p4941_p11), [#allocation25], 4294967024 }
 0x169   : > { %3957 = dma.done.wait (%p4941_p11), [#allocation28], 32  }
 0x16a   : > { %3959 = vsyncadd (%p4941_p11), [#allocation28], 4294967264 }
 0x16b   : > { %3961 = dma.done.wait (%p4941_p11), [#allocation31], 272  }
 0x16c   : > { %3963 = vsyncadd (%p4941_p11), [#allocation31], 4294967024  ;;  %s4942_s9 = sld [smem:[#allocation73_spill]] }
 0x16d   : > { %s4943_s4 = sld [smem:[#allocation76_spill]] }
 0x16e   : > { %s4944_s11 = sld [smem:[#allocation75_spill]] }
 0x16f   : > { %s4945_s22 = sld [smem:[#allocation45_spill]] }
 0x170   : > { %s4946_s15 = sld [smem:[#allocation44_spill]] }
 0x172   : > { %s1210_s30 = sand.u32 1, %s4942_s9  }
 0x173   : > { %p1213_p13 = scmp.lt.s32.totalorder %s4943_s4, 1  ;;  %s4605_s21 = sld [smem:[#allocation7 + %s4943_s4]] }
 0x174   : > { %s4609_s10 = sshll.u32 %s1210_s30, 3  ;;  %s4612_s0 = sld [smem:[#allocation8 + %s4943_s4]] }
 0x175   : > { %s4987_s4 = smov (!%p1213_p13, %s4943_s4), 1  ;;  %p1215_p4 = scmp.lt.s32.totalorder %s4944_s11, 1 }
 0x176   : > { %s2796_s14 = sshll.u32 %s4987_s4, 1  ;;  %s2994_s28 = sshll.u32 %s4987_s4, 3 }
 0x177   : > { %s1216_s16 = scalar_select %p1215_p4, %s4944_s11, 1 }
 0x178   : > { %s1225_s1 = scalar_lea.vmem %s4945_s22, %s2994_s28  ;;  %s1212_s25 = scalar_lea.vmem [#allocation33], %s4609_s10 }
 0x179   : > { %s1218_s20 = sadd.s32 %s2796_s14, %s1216_s16  ;;  %p2800_p0 = scmp.ne.s32.totalorder %s4944_s11, 0 }
 0x17a   : > { %s2797_s23 = sshll.u32 %s1218_s20, 3  ;;  %s4947_s9 = sld [smem:[#allocation49_spill]] (!%p2800_p0) }
 0x17b   : > { %s4619_s24 = scalar_lea.vmem %s4946_s15, %s2797_s23  ;;  %1232 = sbr.rel (%p2800_p0) target bundleno = 695 (0x2b7), region = 200 }
 0x17c   : > { %s4948_s4 = sld [smem:[#allocation51_spill]] (!%p2800_p0)  ;;  %s4949_s20 = scalar_lea.vmem (!%p2800_p0), [#allocation9], %s4567_s19 }
 0x17d   : > { %s4950_s23 = sld [smem:[#allocation58_spill]] (!%p2800_p0)  ;;  %s4061_s19 = smov (!%p2800_p0), 120  }
 0x17e   : > { %s4063_s16 = smov (!%p2800_p0), 104  }
 0x180   : > { %v2998_v0 = vld [vmem:[#allocation14 + $0x8] sm:$0xff]  ;;  %v3000_v1 = vld [vmem:[#allocation15 + $0x8] sm:$0xff]  ;;  %v2997_v4 = vld [vmem:[#allocation14] sm:$0xff]  ;;  %vm1262_vm0 = vcmask 261120   ;;  %vm1392_vm1 = vcmask 60416  }
 0x181   : > { %v3002_v2 = vld [vmem:[#allocation20 + $0x8] sm:$0xff]  ;;  %v3004_v3 = vld [vmem:[#allocation21 + $0x8] sm:$0xff]  ;;  %1272 = vmatpush.bf16.msra.mxu0 %v2998_v0  ;;  %1306 = vmatpush.bf16.msra.mxu1 %v3000_v1  ;;  %v2999_v5 = vld [vmem:[#allocation15] sm:$0xff] }
 0x182   : > { %1348 = vmatpush.bf16.msra.mxu2 %v3002_v2  ;;  %1382 = vmatpush.bf16.msra.mxu3 %v3004_v3  ;;  %v3001_v6 = vld [vmem:[#allocation20] sm:$0xff]  ;;  %v3003_v7 = vld [vmem:[#allocation21] sm:$0xff] }
 0x183   : > { %v2995_v8 = vld [vmem:[%s1225_s1] sm:$0xff]  ;;  %s4062_s1 = smov 112  }
 0x184   : > { %v2996_v9 = vld [vmem:[%s4949_s20] sm:$0xff] }
 0x185   : > { %1273 = vmatpush.bf16.msra.mxu0 %v2997_v4  ;;  %1307 = vmatpush.bf16.msra.mxu1 %v2999_v5  ;;  %v3324_v10 = vld [vmem:[%s4947_s9] ss:$0 sm:$0xff] }
 0x186   : > { %1349 = vmatpush.bf16.msra.mxu2 %v3001_v6  ;;  %1383 = vmatpush.bf16.msra.mxu3 %v3003_v7  ;;  %v3325_v11 = vld [vmem:[%s4948_s4] ss:$0 sm:$0xff] }
 0x187   : > { %v3326_v18 = vld [vmem:[%s4950_s23] ss:$0 sm:$0xff] }
 0x188   : > { %2813 = vmatmul.msk.bf16.vlgmr.msra.gmra.mxu0 %vm1262_vm0, %v2995_v8  ;;  %2822 = vmatmul.msk.bf16.vlgmr.msra.gmra.mxu1 %vm1262_vm0, %v2995_v8  ;;  %v3327_v19 = vld [vmem:[#allocation23] ss:$0 sm:$0xff] }
 0x189   : > { %2835 = vmatmul.msk.bf16.vlgmr.msra.gmra.mxu2 %vm1262_vm0, %v2996_v9  ;;  %2844 = vmatmul.msk.bf16.vlgmr.msra.gmra.mxu3 %vm1262_vm0, %v2996_v9 }
 0x205   : > { %v1275_v12 = vpop.f32.mrf.mxu0  ;;  %v1309_v13 = vpop.f32.mrf.mxu1 }
 0x206   : > { %v1276_v14 = vadd.f32 %v3324_v10, %v1275_v12  ;;  %v1310_v15 = vadd.f32 %v3325_v11, %v1309_v13 }
 0x208   : > { %v1390_v16 = vpack.c.bf16 %v1276_v14, %v1276_v14  ;;  %v1395_v17 = vpack.c.bf16 %v1310_v15, %v1310_v15 }
 0x20a   : > { %1393 = vst.msk [vmem:[#allocation2] sm:$0xf] %vm1392_vm1, %v1390_v16  ;;  %1420 = vrot.lane.b32.xlu1 %v1395_v17, %s4061_s19  ;;  %1451 = vrot.lane.b32.xlu2 %v1390_v16, %s4062_s1 }
 0x20b   : > { %1397 = vst.msk [vmem:[#allocation3] sm:$0xf] %vm1392_vm1, %v1395_v17  ;;  %1409 = vrot.lane.b32.xlu0 %v1390_v16, %s4061_s19 }
 0x20c   : > { %v1351_v20 = vpop.f32.mrf.mxu2  ;;  %v1385_v21 = vpop.f32.mrf.mxu3 }
 0x20d   : > { %v1277_v22 = vpop.f32.mrf.mxu0  ;;  %v1311_v23 = vpop.f32.mrf.mxu1  ;;  %v1352_v24 = vadd.f32 %v3326_v18, %v1351_v20  ;;  %v1386_v25 = vadd.f32 %v3327_v19, %v1385_v21 }
 0x20e   : > { %v1278_v26 = vadd.f32 %v3324_v10, %v1277_v22  ;;  %v1312_v27 = vadd.f32 %v3325_v11, %v1311_v23 }
 0x20f   : > { %v1399_v28 = vpack.c.bf16 %v1352_v24, %v1352_v24  ;;  %v1403_v31 = vpack.c.bf16 %v1386_v25, %v1386_v25 }
 0x210   : > { %v1391_v29 = vpack.c.bf16 %v1278_v26, %v1278_v26  ;;  %v1396_v30 = vpack.c.bf16 %v1312_v27, %v1312_v27 }
 0x211   : > { %1401 = vst.msk [vmem:[#allocation4] sm:$0xf] %vm1392_vm1, %v1399_v28 }
 0x212   : > { %1394 = vst.msk [vmem:[#allocation2 + $0x4] sm:$0xf] %vm1392_vm1, %v1391_v29  ;;  %1460 = vrot.lane.b32.xlu1 %v1395_v17, %s4062_s1  ;;  %1431 = vrot.lane.b32.xlu2 %v1399_v28, %s4061_s19 }
 0x213   : > { %1398 = vst.msk [vmem:[#allocation3 + $0x4] sm:$0xf] %vm1392_vm1, %v1396_v30  ;;  %1496 = vrot.lane.b32.xlu0 %v1395_v17, %s4063_s16 }
 0x214   : > { %1405 = vst.msk [vmem:[#allocation5] sm:$0xf] %vm1392_vm1, %v1403_v31  ;;  %v1387_v32 = vpop.f32.mrf.mxu3  ;;  %v1353_v33 = vpop.f32.mrf.mxu2 }
 0x215   : > { %v1388_v34 = vadd.f32 %v3327_v19, %v1387_v32  ;;  %v1354_v35 = vadd.f32 %v3326_v18, %v1353_v33 }
 0x217   : > { %v1404_v36 = vpack.c.bf16 %v1388_v34, %v1388_v34  ;;  %v1400_v37 = vpack.c.bf16 %v1354_v35, %v1354_v35 }
 0x219   : > { %1406 = vst.msk [vmem:[#allocation5 + $0x4] sm:$0xf] %vm1392_vm1, %v1404_v36 }
 0x21a   : > { %1487 = vrot.lane.b32.xlu1 %v1390_v16, %s4063_s16  ;;  %1478 = vrot.lane.b32.xlu2 %v1403_v31, %s4062_s1  ;;  %1402 = vst.msk [vmem:[#allocation4 + $0x4] sm:$0xf] %vm1392_vm1, %v1400_v37 }
 0x21b   : > { %1442 = vrot.lane.b32.xlu0 %v1403_v31, %s4061_s19 }
 0x222   : > { %1422 = vrot.lane.b32.xlu1 %v1396_v30, %s4061_s19  ;;  %1505 = vrot.lane.b32.xlu2 %v1399_v28, %s4063_s16 }
 0x223   : > { %1469 = vrot.lane.b32.xlu0 %v1399_v28, %s4062_s1 }
 0x22a   : > { %1498 = vrot.lane.b32.xlu1 %v1396_v30, %s4063_s16  ;;  %1462 = vrot.lane.b32.xlu2 %v1396_v30, %s4062_s1 }
 0x22b   : > { %1411 = vrot.lane.b32.xlu0 %v1391_v29, %s4061_s19 }
 0x232   : > { %1444 = vrot.lane.b32.xlu1 %v1404_v36, %s4061_s19  ;;  %1489 = vrot.lane.b32.xlu2 %v1391_v29, %s4063_s16 }
 0x233   : > { %1453 = vrot.lane.b32.xlu0 %v1391_v29, %s4062_s1 }
 0x23a   : > { %1471 = vrot.lane.b32.xlu1 %v1400_v37, %s4062_s1  ;;  %1433 = vrot.lane.b32.xlu2 %v1400_v37, %s4061_s19 }
 0x23b   : > { %1480 = vrot.lane.b32.xlu0 %v1404_v36, %s4062_s1 }
 0x242   : > { %1514 = vrot.lane.b32.xlu1 %v1403_v31, %s4063_s16  ;;  %1516 = vrot.lane.b32.xlu2 %v1404_v36, %s4063_s16 }
 0x243   : > { %1507 = vrot.lane.b32.xlu0 %v1400_v37, %s4063_s16 }
 0x264   : > { %v1452_v38 = vpop.permute.xlu2 %1451 }
 0x265   : > { %1458 = vst.msk [vmem:[#allocation2 + $0x10] sm:$0xf] %vm1392_vm1, %v1452_v38 }
 0x26c   : > { %v1432_v39 = vpop.permute.xlu2 %1431 }
 0x26d   : > { %1438 = vst.msk [vmem:[#allocation4 + $0x8] sm:$0xf] %vm1392_vm1, %v1432_v39 }
 0x274   : > { %v1479_v40 = vpop.permute.xlu2 %1478 }
 0x275   : > { %1485 = vst.msk [vmem:[#allocation5 + $0x10] sm:$0xf] %vm1392_vm1, %v1479_v40 }
 0x27c   : > { %v1421_v41 = vpop.permute.xlu1 %1420  ;;  %v1506_v42 = vpop.permute.xlu2 %1505 }
 0x27d   : > { %1427 = vst.msk [vmem:[#allocation3 + $0x8] sm:$0xf] %vm1392_vm1, %v1421_v41  ;;  %v1410_v43 = vpop.permute.xlu0 %1409 }
 0x27e   : > { %1512 = vst.msk [vmem:[#allocation4 + $0x18] sm:$0xf] %vm1392_vm1, %v1506_v42 }
 0x27f   : > { %1416 = vst.msk [vmem:[#allocation2 + $0x8] sm:$0xf] %vm1392_vm1, %v1410_v43 }
 0x284   : > { %v1461_v44 = vpop.permute.xlu1 %1460  ;;  %v1463_v45 = vpop.permute.xlu2 %1462 }
 0x285   : > { %1467 = vst.msk [vmem:[#allocation3 + $0x10] sm:$0xf] %vm1392_vm1, %v1461_v44  ;;  %v1497_v46 = vpop.permute.xlu0 %1496 }
 0x286   : > { %1468 = vst.msk [vmem:[#allocation3 + $0x14] sm:$0xf] %vm1392_vm1, %v1463_v45 }
 0x287   : > { %1503 = vst.msk [vmem:[#allocation3 + $0x18] sm:$0xf] %vm1392_vm1, %v1497_v46 }
 0x28c   : > { %v1488_v47 = vpop.permute.xlu1 %1487  ;;  %v1490_v48 = vpop.permute.xlu2 %1489 }
 0x28d   : > { %1494 = vst.msk [vmem:[#allocation2 + $0x18] sm:$0xf] %vm1392_vm1, %v1488_v47  ;;  %v1443_v49 = vpop.permute.xlu0 %1442 }
 0x28e   : > { %1495 = vst.msk [vmem:[#allocation2 + $0x1c] sm:$0xf] %vm1392_vm1, %v1490_v48 }
 0x28f   : > { %1449 = vst.msk [vmem:[#allocation5 + $0x8] sm:$0xf] %vm1392_vm1, %v1443_v49 }
 0x294   : > { %v1423_v50 = vpop.permute.xlu1 %1422  ;;  %v1434_v51 = vpop.permute.xlu2 %1433 }
 0x295   : > { %1428 = vst.msk [vmem:[#allocation3 + $0xc] sm:$0xf] %vm1392_vm1, %v1423_v50  ;;  %v1470_v52 = vpop.permute.xlu0 %1469 }
 0x296   : > { %1439 = vst.msk [vmem:[#allocation4 + $0xc] sm:$0xf] %vm1392_vm1, %v1434_v51 }
 0x297   : > { %1476 = vst.msk [vmem:[#allocation4 + $0x10] sm:$0xf] %vm1392_vm1, %v1470_v52 }
 0x29c   : > { %v1499_v53 = vpop.permute.xlu1 %1498  ;;  %v1517_v54 = vpop.permute.xlu2 %1516 }
 0x29d   : > { %1504 = vst.msk [vmem:[#allocation3 + $0x1c] sm:$0xf] %vm1392_vm1, %v1499_v53  ;;  %v1412_v55 = vpop.permute.xlu0 %1411 }
 0x29e   : > { %1522 = vst.msk [vmem:[#allocation5 + $0x1c] sm:$0xf] %vm1392_vm1, %v1517_v54 }
 0x29f   : > { %1417 = vst.msk [vmem:[#allocation2 + $0xc] sm:$0xf] %vm1392_vm1, %v1412_v55 }
 0x2a4   : > { %v1445_v56 = vpop.permute.xlu1 %1444 }
 0x2a5   : > { %1450 = vst.msk [vmem:[#allocation5 + $0xc] sm:$0xf] %vm1392_vm1, %v1445_v56  ;;  %v1454_v57 = vpop.permute.xlu0 %1453 }
 0x2a6   : > { %1459 = vst.msk [vmem:[#allocation2 + $0x14] sm:$0xf] %vm1392_vm1, %v1454_v57 }
 0x2ac   : > { %v1472_v58 = vpop.permute.xlu1 %1471 }
 0x2ad   : > { %1477 = vst.msk [vmem:[#allocation4 + $0x14] sm:$0xf] %vm1392_vm1, %v1472_v58  ;;  %v1481_v59 = vpop.permute.xlu0 %1480 }
 0x2ae   : > { %1486 = vst.msk [vmem:[#allocation5 + $0x14] sm:$0xf] %vm1392_vm1, %v1481_v59 }
 0x2b4   : > { %v1515_v60 = vpop.permute.xlu1 %1514 }
 0x2b5   : > { %1521 = vst.msk [vmem:[#allocation5 + $0x18] sm:$0xf] %vm1392_vm1, %v1515_v60  ;;  %v1508_v61 = vpop.permute.xlu0 %1507 }
 0x2b6   : > { %1513 = vst.msk [vmem:[#allocation4 + $0x1c] sm:$0xf] %vm1392_vm1, %v1508_v61 }
 0x2b7 PF: > { %v4677_v62 = vld [vmem:[%s4619_s24] sm:$0xff]  ;;  %vm1541_vm2 = vcmask 261120   ;;  %v4064_v0 = vmov 32.0   ;;  %v3014_v12 = vld [vmem:[#allocation12 + $0x8] sm:$0xff]  ;;  %v3013_v13 = vld [vmem:[#allocation12] sm:$0xff]  ;;  %vm1656_vm4 = vcmask 64512   ;;  %v1524_v51 = vlaneseq }
 0x2b8   : > { %v1542_v63 = vsel %vm1541_vm2, %v4677_v62, 0.0  ;;  %3340 = vrcp.f32 %v4064_v0  ;;  %1630 = vmatpush.bf16.msra.mxu0 %v3014_v12  ;;  %v3005_v14 = vld [vmem:[#allocation2] sm:$0xff]  ;;  %s4951_s24 = sld [smem:[#allocation54_spill]]  ;;  %v3008_v32 = vld [vmem:[#allocation2 + $0x18] sm:$0xff]  ;;  %s4065_s15 = smov 104   ;;  %v3006_v39 = vld [vmem:[#allocation2 + $0x8] sm:$0xff]  ;;  %v1531_v56 = vstv %s4605_s21 }
 0x2b9   : > { %1543 = vadd.xlane.f32.xlu0 %v1542_v63  ;;  %v1661_v17 = vsel %vm1656_vm4, %v3005_v14, 0  ;;  %s4952_s11 = sld [smem:[#allocation55_spill]]  ;;  %v1733_v33 = vsel %vm1656_vm4, %v3008_v32, 0  ;;  %s4066_s14 = smov 120   ;;  %v1685_v40 = vsel %vm1656_vm4, %v3006_v39, 0  ;;  %v3007_v41 = vld [vmem:[#allocation2 + $0x10] sm:$0xff] }
 0x2ba   : > { %1670 = vmatpush.bf16.xpose.msra.mxu1 %v1661_v17  ;;  %s4953_s22 = sld [smem:[#allocation48_spill]]  ;;  %s4067_s28 = smov 112   ;;  %1694 = vmatpush.bf16.xpose.msra.mxu2 %v1685_v40  ;;  %v1709_v42 = vsel %vm1656_vm4, %v3007_v41, 0  ;;  %v1525_v52 = vshrl.u32 %v1524_v51, 7  ;;  %v4703_v55 = vand.u32 127, %v1524_v51  ;;  %vm1748_vm11 = vcmask 130048  }
 0x2bb   : > { %s4954_s9 = sld [smem:[#allocation75_spill]]  ;;  %1718 = vmatpush.bf16.xpose.msra.mxu3 %v1709_v42  ;;  %v4068_v57 = vmov -1e+30   ;;  %s4069_s21 = smov 8   ;;  %vm1899_vm12 = vcmask 195584  }
 0x2bc   : > { %1631 = vmatpush.bf16.msra.mxu0 %v3013_v13  ;;  %vm1532_vm9 = vcmp.lt.s32.totalorder %v4703_v55, %v1531_v56  ;;  %s4070_s20 = smov 24   ;;  %s4071_s23 = smov 16  }
 0x2bd   : > { %s4955_s19 = sld [smem:[#allocation53_spill]] }
 0x2be   : > { %v3341_v1 = vpop.eup %3340  ;;  %v3328_v25 = vld [vmem:[%s4951_s24] ss:$0 sm:$0xff]  ;;  %s4956_s1 = sld [smem:[#allocation57_spill]] }
 0x2bf   : > { %v1546_v2 = vmul.f32 32.0, %v3341_v1  ;;  %vm1550_vm3 = vweird.f32 %v3341_v1  ;;  %v3329_v28 = vld [vmem:[%s4952_s11] ss:$0 sm:$0xff]  ;;  %s4958_s16 = sld [smem:[#allocation70_spill]] }
 0x2c0   : > { %1742 = vmatpush.bf16.xpose.msrb.mxu0 %v1733_v33  ;;  %v3330_v34 = vld [vmem:[%s4953_s22] ss:$0 sm:$0xff]  ;;  %s4959_s24 = sld [smem:[#allocation67_spill]] }
 0x2c1   : > { %v1547_v3 = vsub.f32 1.0, %v1546_v2  ;;  %s2845_s4 = sshll.u32 %s4954_s9, 3  ;;  %s4960_s11 = sld [smem:[#allocation76_spill]] }
 0x2c2   : > { %v1526_v53 = vstv %s2845_s4  ;;  %s4961_s22 = sld [smem:[#allocation68_spill]] }
 0x2c3   : > { %v1548_v4 = vmul.f32 %v3341_v1, %v1547_v3  ;;  %v1527_v54 = vadd.s32 %v1526_v53, %v1525_v52 }
 0x2c5   : > { %v1549_v5 = vadd.f32 %v3341_v1, %v1548_v4  ;;  %vm1530_vm8 = vcmp.le.s32.totalorder %v4703_v55, %v1527_v54 }
 0x2c6   : > { %vm1533_vm10 = vmand %vm1530_vm8, %vm1532_vm9  ;;  %vm2444_vm9 = vcmask 523264  }
 0x2c7   : > { %v4681_v6 = vsel %vm1550_vm3, %v3341_v1, %v1549_v5  ;;  %v1534_v58 = vsel %vm1533_vm10, 0.0, %v4068_v57  ;;  %s2989_s4 = sshll.u32 %s4960_s11, 1 }
 0x32c   : > { %v1544_v7 = vpop.xlane.xlu0 %1543 }
 0x32d   : > { %v1552_v8 = vmul.f32 %v4681_v6, %v1544_v7 }
 0x32f   : > { %v1553_v9 = vsub.f32 %v4677_v62, %v1552_v8 }
 0x331   : > { %v1554_v10 = vmul.f32 %v1553_v9, %v1553_v9 }
 0x333   : > { %v1555_v11 = vsel %vm1541_vm2, %v1554_v10, 0.0 }
 0x334   : > { %1556 = vadd.xlane.f32.xlu0 %v1555_v11  ;;  %v3012_v11 = vld [vmem:[#allocation3 + $0x18] sm:$0xff] }
 0x3a7   : > { %v1557_v15 = vpop.xlane.xlu0 %1556 }
 0x3a8   : > { %v1558_v16 = vmul.f32 %v1557_v15, %v4681_v6  ;;  %v3010_v15 = vld [vmem:[#allocation3 + $0x8] sm:$0xff] }
 0x3a9   : > { %1827 = vmatpush.bf16.msrb.mxu2 %v3010_v15 }
 0x3aa   : > { %v1559_v18 = vadd.f32 1e-06, %v1558_v16 }
 0x3ac   : > { %3342 = vrsqrt.f32 %v1559_v18  ;;  %vm1566_vm6 = vweird.f32 %v1559_v18 }
 0x3b2   : > { %v3343_v19 = vpop.eup %3342 }
 0x3b3   : > { %v1561_v20 = vmul.f32 %v3343_v19, %v1559_v18  ;;  %vm1567_vm5 = vweird.f32 %v3343_v19  ;;  %v3011_v18 = vld [vmem:[#allocation3 + $0x10] sm:$0xff] }
 0x3b4   : > { %vm1568_vm7 = vmor %vm1566_vm6, %vm1567_vm5  ;;  %1849 = vmatpush.bf16.msrb.mxu3 %v3011_v18 }
 0x3b5   : > { %v1562_v21 = vmul.f32 %v3343_v19, %v1561_v20 }
 0x3b7   : > { %v1563_v22 = vmul.f32 0.5, %v1562_v21 }
 0x3b9   : > { %v1564_v23 = vsub.f32 1.5, %v1563_v22 }
 0x3bb   : > { %v1565_v24 = vmul.f32 %v3343_v19, %v1564_v23 }
 0x3bd   : > { %v1569_v26 = vsel %vm1568_vm7, %v3343_v19, %v1565_v24  ;;  %v3009_v19 = vld [vmem:[#allocation3] sm:$0xff] }
 0x3be   : > { %v1570_v27 = vmul.f32 %v1569_v26, %v1553_v9  ;;  %1805 = vmatpush.bf16.msrb.mxu1 %v3009_v19  ;;  %v3026_v19 = vld [vmem:[#allocation18 + $0x8] sm:$0xff] }
 0x3c0   : > { %v1574_v29 = vmul.f32 %v3328_v25, %v1570_v27 }
 0x3c2   : > { %v1578_v30 = vadd.f32 %v3329_v28, %v1574_v29 }
 0x3c4   : > { %v1605_v31 = vpack.c.bf16 %v1578_v30, %v1578_v30 }
 0x3c6   : > { %2854 = vmatmul.msk.bf16.vlgmr.msra.gmra.mxu0 %vm1541_vm2, %v1605_v31 }
 0x3c7   : > { %1871 = vmatpush.bf16.msra.mxu0 %v3012_v11 }
 0x443   : > { %v1633_v35 = vpop.f32.mrf.mxu0 }
 0x444   : > { %v1634_v36 = vadd.f32 %v3330_v34, %v1633_v35 }
 0x446   : > { %1644 = vrot.lane.b32.xlu2 %v1634_v36, %s4065_s15  ;;  %1638 = vrot.lane.b32.xlu1 %v1634_v36, %s4066_s14  ;;  %v1647_v37 = vpack.c.bf16 %v1634_v36, %v1634_v36 }
 0x448   : > { %2859 = vmatmul.msk.bf16.vlgmr.msra.gmra.mxu1 %vm1656_vm4, %v1647_v37 }
 0x44b   : > { %v1635_v38 = vpop.f32.mrf.mxu0 }
 0x44e   : > { %1641 = vrot.lane.b32.xlu1 %v1634_v36, %s4067_s28 }
 0x4a0   : > { %v1645_v43 = vpop.permute.xlu2 %1644 }
 0x4a1   : > { %v1650_v44 = vpack.c.bf16 %v1645_v43, %v1645_v43 }
 0x4a3   : > { %2874 = vmatmul.msk.bf16.vlgmr.msrb.gmra.mxu0 %vm1656_vm4, %v1650_v44 }
 0x4b8   : > { %v1639_v45 = vpop.permute.xlu1 %1638 }
 0x4b9   : > { %v1648_v46 = vpack.c.bf16 %v1639_v45, %v1639_v45 }
 0x4bb   : > { %2864 = vmatmul.msk.bf16.vlgmr.msra.gmra.mxu2 %vm1656_vm4, %v1648_v46 }
 0x4bc   : > { %2017 = vmatpush.bf16.msra.mxu2 %v3026_v19 }
 0x4c0   : > { %v1642_v47 = vpop.permute.xlu1 %1641 }
 0x4c1   : > { %v1649_v48 = vpack.c.bf16 %v1642_v47, %v1642_v47 }
 0x4c3   : > { %2869 = vmatmul.msk.bf16.vlgmr.msra.gmra.mxu3 %vm1656_vm4, %v1649_v48 }
 0x4c5   : > { %v1672_v49 = vpop.f32.mrf.mxu1 }
 0x4c6   : > { %v1673_v8 = vadd.f32 %v1672_v49, %v1534_v58 }
 0x4c8   : > { %v1749_v10 = vsel %vm1748_vm11, %v1673_v8, -inf }
 0x4cd   : > { %v1674_v50 = vpop.f32.mrf.mxu1 }
 0x520   : > { %v1744_v59 = vpop.f32.mrf.mxu0 }
 0x521   : > { %v1745_v60 = vadd.f32 %v1744_v59, %v1534_v58  ;;  %v3015_v59 = vld [vmem:[#allocation17] sm:$0xff] }
 0x523   : > { %v1758_v61 = vsel %vm1748_vm11, %v1745_v60, -inf }
 0x524   : > { %1759 = vmax.xlane.f32.xlu1 %v1758_v61 }
 0x528   : > { %v1746_v63 = vpop.f32.mrf.mxu0 }
 0x53e   : > { %v1696_v0 = vpop.f32.mrf.mxu2 }
 0x53f   : > { %v1697_v1 = vadd.f32 %v1696_v0, %v1534_v58 }
 0x541   : > { %v1752_v2 = vsel %vm1748_vm11, %v1697_v1, -inf }
 0x542   : > { %1753 = vmax.xlane.f32.xlu2 %v1752_v2 }
 0x546   : > { %v1698_v3 = vpop.f32.mrf.mxu2  ;;  %v1720_v4 = vpop.f32.mrf.mxu3 }
 0x547   : > { %v1721_v5 = vadd.f32 %v1720_v4, %v1534_v58  ;;  %v3016_v58 = vld [vmem:[#allocation17 + $0x8] sm:$0xff] }
 0x548   : > { %1926 = vmatpush.bf16.msra.mxu1 %v3016_v58 }
 0x549   : > { %v1755_v7 = vsel %vm1748_vm11, %v1721_v5, -inf }
 0x54a   : > { %1756 = vmax.xlane.f32.xlu0 %v1755_v7 }
 0x54c   : > { %1927 = vmatpush.bf16.msra.mxu1 %v3015_v59  ;;  %v1535_v59 = vstv %s4612_s0  ;;  %s4957_s0 = sld [smem:[#allocation69_spill]] }
 0x54d   : > { %vm1536_vm0 = vcmp.lt.s32.totalorder %v4703_v55, %v1535_v59  ;;  %v3027_v59 = vld [vmem:[#allocation24] sm:$0xff] }
 0x54e   : > { %v1722_v9 = vpop.f32.mrf.mxu3 }
 0x552   : > { %1750 = vmax.xlane.f32.xlu0 %v1749_v10 }
 0x597   : > { %v1760_v12 = vpop.xlane.xlu1 %1759 }
 0x598   : > { %v1764_v13 = vsub.f32 %v1745_v60, %v1760_v12 }
 0x59a   : > { %v1771_v14 = vmul.f32 1.442695, %v1764_v13 }
 0x59c   : > { %3344 = vpow2.f32 %v1771_v14 }
 0x5a2   : > { %v3345_v16 = vpop.eup %3344 }
 0x5a3   : > { %v1788_v17 = vpack.c.bf16 %v3345_v16, %v3345_v16  ;;  %v1782_v36 = vsel %vm1748_vm11, %v3345_v16, 0.0 }
 0x5a5   : > { %2894 = vmatmul.msk.bf16.vlgmr.msra.gmra.mxu0 %vm1748_vm11, %v1788_v17 }
 0x5b5   : > { %v1754_v20 = vpop.xlane.xlu2 %1753 }
 0x5b6   : > { %v1762_v21 = vsub.f32 %v1697_v1, %v1754_v20  ;;  %v3025_v20 = vld [vmem:[#allocation18] sm:$0xff] }
 0x5b7   : > { %2018 = vmatpush.bf16.msra.mxu2 %v3025_v20 }
 0x5b8   : > { %v1767_v22 = vmul.f32 1.442695, %v1762_v21 }
 0x5ba   : > { %3346 = vpow2.f32 %v1767_v22 }
 0x5bd   : > { %v1757_v23 = vpop.xlane.xlu0 %1756 }
 0x5be   : > { %v1763_v24 = vsub.f32 %v1721_v5, %v1757_v23 }
 0x5c0   : > { %v3347_v25 = vpop.eup %3346  ;;  %v1769_v26 = vmul.f32 1.442695, %v1763_v24 }
 0x5c1   : > { %v1776_v27 = vsel %vm1748_vm11, %v3347_v25, 0.0  ;;  %v1786_v28 = vpack.c.bf16 %v3347_v25, %v3347_v25 }
 0x5c2   : > { %3348 = vpow2.f32 %v1769_v26  ;;  %1777 = vadd.xlane.f32.xlu0 %v1776_v27 }
 0x5c3   : > { %2884 = vmatmul.msk.bf16.vlgmr.msrb.gmra.mxu2 %vm1748_vm11, %v1786_v28 }
 0x5c5   : > { %v1751_v29 = vpop.xlane.xlu0 %1750 }
 0x5c6   : > { %v1761_v30 = vsub.f32 %v1673_v8, %v1751_v29  ;;  %v3331_v8 = vld [vmem:[%s4955_s19] ss:$0 sm:$0xff]  ;;  %s2478_s19 = sshll.u32 %s1212_s25, 4  ;;  %s2479_s19 = int_to_ptr.vmem [resolvable:$true] %s2478_s19 }
 0x5c8   : > { %v3349_v31 = vpop.eup %3348  ;;  %v1765_v32 = vmul.f32 1.442695, %v1761_v30 }
 0x5c9   : > { %v1779_v33 = vsel %vm1748_vm11, %v3349_v31, 0.0  ;;  %v1787_v34 = vpack.c.bf16 %v3349_v31, %v3349_v31  ;;  %v3332_v31 = vld [vmem:[#allocation27] ss:$0 sm:$0xff] }
 0x5ca   : > { %3350 = vpow2.f32 %v1765_v32  ;;  %1780 = vadd.xlane.f32.xlu0 %v1779_v33 }
 0x5cb   : > { %2889 = vmatmul.msk.bf16.vlgmr.msrb.gmra.mxu3 %vm1748_vm11, %v1787_v34  ;;  %v3333_v34 = vld [vmem:[#allocation29] ss:$0 sm:$0xff] }
 0x5d0   : > { %v3351_v35 = vpop.eup %3350 }
 0x5d1   : > { %v1773_v37 = vsel %vm1748_vm11, %v3351_v35, 0.0  ;;  %v1785_v38 = vpack.c.bf16 %v3351_v35, %v3351_v35 }
 0x5d2   : > { %1783 = vadd.xlane.f32.xlu0 %v1782_v36  ;;  %1774 = vadd.xlane.f32.xlu2 %v1773_v37 }
 0x5d3   : > { %2879 = vmatmul.msk.bf16.vlgmr.msrb.gmra.mxu1 %vm1748_vm11, %v1785_v38  ;;  %v3020_v38 = vld [vmem:[#allocation4 + $0x18] sm:$0xff] }
 0x622   : > { %v1873_v39 = vpop.f32.mrf.mxu0 }
 0x62a   : > { %v1875_v40 = vpop.f32.mrf.mxu0 }
 0x62b   : > { %v2119_v40 = vsel %vm1656_vm4, %v3020_v38, 0 }
 0x62c   : > { %2128 = vmatpush.bf16.xpose.msrb.mxu2 %v2119_v40 }
 0x635   : > { %v1778_v41 = vpop.xlane.xlu0 %1777 }
 0x636   : > { %3352 = vrcp.f32 %v1778_v41 }
 0x63c   : > { %v3353_v44 = vpop.eup %3352 }
 0x63d   : > { %v1781_v42 = vpop.xlane.xlu0 %1780 }
 0x645   : > { %v1784_v43 = vpop.xlane.xlu0 %1783  ;;  %v1775_v60 = vpop.xlane.xlu2 %1774 }
 0x646   : > { %v1829_v45 = vpop.f32.mrf.mxu2  ;;  %3354 = vrcp.f32 %v1784_v43 }
 0x647   : > { %v1882_v46 = vmul.f32 %v3353_v44, %v1829_v45  ;;  %3356 = vrcp.f32 %v1781_v42  ;;  %v3334_v42 = vld [vmem:[%s4956_s1] ss:$0 sm:$0xff] }
 0x648   : > { %3358 = vrcp.f32 %v1775_v60  ;;  %v1537_v60 = vsel %vm1536_vm0, 0.0, %v4068_v57 }
 0x649   : > { %1886 = vrot.lane.b32.xlu0 %v1882_v46, %s4069_s21 }
 0x64c   : > { %v3355_v47 = vpop.eup %3354 }
 0x64d   : > { %v3357_v48 = vpop.eup %3356  ;;  %v1884_v51 = vmul.f32 %v3355_v47, %v1873_v39  ;;  %v3018_v39 = vld [vmem:[#allocation4 + $0x8] sm:$0xff]  ;;  %v3019_v47 = vld [vmem:[#allocation4 + $0x10] sm:$0xff] }
 0x64e   : > { %v1831_v49 = vpop.f32.mrf.mxu2  ;;  %v1851_v50 = vpop.f32.mrf.mxu3  ;;  %v2071_v41 = vsel %vm1656_vm4, %v3018_v39, 0 }
 0x64f   : > { %v1883_v52 = vmul.f32 %v3357_v48, %v1851_v50  ;;  %1894 = vrot.lane.b32.xlu1 %v1884_v51, %s4070_s20  ;;  %v3359_v61 = vpop.eup %3358  ;;  %2080 = vmatpush.bf16.xpose.msrb.mxu0 %v2071_v41  ;;  %v2095_v48 = vsel %vm1656_vm4, %v3019_v47, 0 }
 0x650   : > { %v1807_v53 = vpop.f32.mrf.mxu1  ;;  %2104 = vmatpush.bf16.xpose.msrb.mxu1 %v2095_v48 }
 0x651   : > { %1890 = vrot.lane.b32.xlu2 %v1883_v52, %s4071_s23  ;;  %v1881_v0 = vmul.f32 %v3359_v61, %v1807_v53 }
 0x656   : > { %v1853_v54 = vpop.f32.mrf.mxu3 }
 0x658   : > { %v1809_v56 = vpop.f32.mrf.mxu1 }
 0x6ab   : > { %v1891_v2 = vpop.permute.xlu2 %1890 }
 0x6bb   : > { %v1887_v63 = vpop.permute.xlu0 %1886 }
 0x6bc   : > { %v1897_v1 = vsel %vm1656_vm4, %v1881_v0, %v1887_v63 }
 0x6bd   : > { %v1898_v4 = vsel %vm1748_vm11, %v1897_v1, %v1891_v2 }
 0x6c1   : > { %v1895_v3 = vpop.permute.xlu1 %1894 }
 0x6c2   : > { %v1900_v5 = vsel %vm1899_vm12, %v1898_v4, %v1895_v3 }
 0x6c3   : > { %v1901_v7 = vpack.c.bf16 %v1900_v5, %v1900_v5 }
 0x6c5   : > { %2903 = vmatmul.msk.bf16.vlgmr.msra.gmra.mxu1 %vm1541_vm2, %v1901_v7 }
 0x742   : > { %v1929_v9 = vpop.f32.mrf.mxu1 }
 0x743   : > { %v1930_v10 = vadd.f32 %v3331_v8, %v1929_v9 }
 0x745   : > { %v4730_v11 = vadd.f32 %v1930_v10, %v4677_v62  ;;  %v3017_v62 = vld [vmem:[#allocation4] sm:$0xff] }
 0x746   : > { %v2047_v23 = vsel %vm1656_vm4, %v3017_v62, 0 }
 0x747   : > { %v1936_v12 = vsel %vm1541_vm2, %v4730_v11, 0.0  ;;  %2056 = vmatpush.bf16.xpose.msra.mxu3 %v2047_v23 }
 0x748   : > { %1937 = vadd.xlane.f32.xlu0 %v1936_v12  ;;  %v3024_v12 = vld [vmem:[#allocation5 + $0x18] sm:$0xff] }
 0x74a   : > { %v1931_v13 = vpop.f32.mrf.mxu1 }
 0x74b   : > { %v3022_v13 = vld [vmem:[#allocation5 + $0x8] sm:$0xff] }
 0x74c   : > { %2212 = vmatpush.bf16.msra.mxu0 %v3022_v13 }
 0x7bb   : > { %v1938_v14 = vpop.xlane.xlu0 %1937 }
 0x7bc   : > { %v1939_v15 = vmul.f32 %v1938_v14, %v4681_v6  ;;  %v3023_v14 = vld [vmem:[#allocation5 + $0x10] sm:$0xff] }
 0x7bd   : > { %2234 = vmatpush.bf16.msra.mxu1 %v3023_v14 }
 0x7be   : > { %v1940_v16 = vsub.f32 %v4730_v11, %v1939_v15  ;;  %v3021_v15 = vld [vmem:[#allocation5] sm:$0xff] }
 0x7bf   : > { %2190 = vmatpush.bf16.msrb.mxu3 %v3021_v15 }
 0x7c0   : > { %v1941_v17 = vmul.f32 %v1940_v16, %v1940_v16 }
 0x7c2   : > { %v1942_v18 = vsel %vm1541_vm2, %v1941_v17, 0.0 }
 0x7c3   : > { %1943 = vadd.xlane.f32.xlu2 %v1942_v18 }
 0x836   : > { %v1944_v21 = vpop.xlane.xlu2 %1943 }
 0x837   : > { %v1945_v22 = vmul.f32 %v1944_v21, %v4681_v6 }
 0x839   : > { %v1946_v24 = vadd.f32 1e-06, %v1945_v22 }
 0x83b   : > { %3360 = vrsqrt.f32 %v1946_v24  ;;  %vm1953_vm14 = vweird.f32 %v1946_v24 }
 0x841   : > { %v3361_v25 = vpop.eup %3360 }
 0x842   : > { %v1948_v26 = vmul.f32 %v3361_v25, %v1946_v24  ;;  %vm1954_vm13 = vweird.f32 %v3361_v25 }
 0x843   : > { %vm1955_vm15 = vmor %vm1953_vm14, %vm1954_vm13 }
 0x844   : > { %v1949_v27 = vmul.f32 %v3361_v25, %v1948_v26 }
 0x846   : > { %v1950_v28 = vmul.f32 0.5, %v1949_v27 }
 0x848   : > { %v1951_v29 = vsub.f32 1.5, %v1950_v28 }
 0x84a   : > { %v1952_v30 = vmul.f32 %v3361_v25, %v1951_v29 }
 0x84c   : > { %v1956_v32 = vsel %vm1955_vm15, %v3361_v25, %v1952_v30 }
 0x84d   : > { %v1957_v33 = vmul.f32 %v1956_v32, %v1940_v16 }
 0x84f   : > { %v1961_v35 = vmul.f32 %v3332_v31, %v1957_v33 }
 0x851   : > { %v1965_v36 = vadd.f32 %v3333_v34, %v1961_v35 }
 0x853   : > { %v1992_v37 = vpack.c.bf16 %v1965_v36, %v1965_v36 }
 0x855   : > { %2912 = vmatmul.msk.bf16.vlgmr.msra.gmra.mxu2 %vm1541_vm2, %v1992_v37 }
 0x856   : > { %2256 = vmatpush.bf16.msra.mxu2 %v3024_v12 }
 0x8d8   : > { %v2020_v43 = vpop.f32.mrf.mxu2 }
 0x8d9   : > { %v2021_v44 = vadd.f32 %v3334_v42, %v2020_v43 }
 0x8db   : > { %v2034_v45 = vpack.c.bf16 %v2021_v44, %v2021_v44  ;;  %2031 = vrot.lane.b32.xlu1 %v2021_v44, %s4065_s15  ;;  %s4962_s15 = sld [smem:[#allocation71_spill]] }
 0x8dd   : > { %2917 = vmatmul.msk.bf16.vlgmr.msra.gmra.mxu3 %vm1656_vm4, %v2034_v45 }
 0x8e0   : > { %v2022_v46 = vpop.f32.mrf.mxu2 }
 0x8e3   : > { %2025 = vrot.lane.b32.xlu1 %v2021_v44, %s4066_s14  ;;  %s4963_s14 = smov %s4962_s15 }
 0x8e4   : > { %s3878_s11 = scalar_lea.hbm %s4963_s14, 32 }
 0x8eb   : > { %2028 = vrot.lane.b32.xlu1 %v2021_v44, %s4067_s28 }
 0x94d   : > { %v2032_v49 = vpop.permute.xlu1 %2031 }
 0x94e   : > { %v2037_v50 = vpack.c.bf16 %v2032_v49, %v2032_v49 }
 0x950   : > { %2932 = vmatmul.msk.bf16.vlgmr.msrb.gmra.mxu2 %vm1656_vm4, %v2037_v50 }
 0x955   : > { %v2026_v51 = vpop.permute.xlu1 %2025 }
 0x956   : > { %v2035_v52 = vpack.c.bf16 %v2026_v51, %v2026_v51 }
 0x958   : > { %2922 = vmatmul.msk.bf16.vlgmr.msrb.gmra.mxu0 %vm1656_vm4, %v2035_v52 }
 0x95d   : > { %v2029_v53 = vpop.permute.xlu1 %2028 }
 0x95e   : > { %v2036_v54 = vpack.c.bf16 %v2029_v53, %v2029_v53 }
 0x960   : > { %v2058_v56 = vpop.f32.mrf.mxu3  ;;  %2927 = vmatmul.msk.bf16.vlgmr.msrb.gmra.mxu1 %vm1656_vm4, %v2036_v54 }
 0x961   : > { %v2059_v5 = vadd.f32 %v2058_v56, %v1537_v60 }
 0x963   : > { %v2134_v55 = vsel %vm1748_vm11, %v2059_v5, -inf }
 0x968   : > { %v2060_v58 = vpop.f32.mrf.mxu3 }
 0x969   : > { %v3028_v58 = vld [vmem:[#allocation24 + $0x8] sm:$0xff] }
 0x96a   : > { %2310 = vmatpush.bf16.msra.mxu3 %v3028_v58 }
 0x96e   : > { %2311 = vmatpush.bf16.msra.mxu3 %v3027_v59  ;;  %v3339_v59 = vld [vmem:[%s4961_s22] ss:$0 sm:$0xff] }
 0x9d3   : > { %v2130_v61 = vpop.f32.mrf.mxu2 }
 0x9d4   : > { %v2131_v63 = vadd.f32 %v2130_v61, %v1537_v60 }
 0x9d5   : > { %v2082_v0 = vpop.f32.mrf.mxu0 }
 0x9d6   : > { %v2083_v1 = vadd.f32 %v2082_v0, %v1537_v60  ;;  %v2143_v2 = vsel %vm1748_vm11, %v2131_v63, -inf }
 0x9d7   : > { %2144 = vmax.xlane.f32.xlu1 %v2143_v2 }
 0x9d8   : > { %v2137_v3 = vsel %vm1748_vm11, %v2083_v1, -inf }
 0x9d9   : > { %2138 = vmax.xlane.f32.xlu0 %v2137_v3 }
 0x9db   : > { %v2132_v4 = vpop.f32.mrf.mxu2 }
 0x9dd   : > { %v2084_v7 = vpop.f32.mrf.mxu0  ;;  %v2106_v8 = vpop.f32.mrf.mxu1 }
 0x9de   : > { %v2107_v9 = vadd.f32 %v2106_v8, %v1537_v60  ;;  %v3335_v8 = vld [vmem:[#allocation26] ss:$0 sm:$0xff] }
 0x9e0   : > { %v2140_v10 = vsel %vm1748_vm11, %v2107_v9, -inf }
 0x9e1   : > { %2141 = vmax.xlane.f32.xlu2 %v2140_v10  ;;  %2135 = vmax.xlane.f32.xlu0 %v2134_v55 }
 0x9e5   : > { %v2108_v57 = vpop.f32.mrf.mxu1 }
 0xa4a   : > { %v2145_v16 = vpop.xlane.xlu1 %2144 }
 0xa4b   : > { %v2149_v17 = vsub.f32 %v2131_v63, %v2145_v16 }
 0xa4c   : > { %v2139_v18 = vpop.xlane.xlu0 %2138 }
 0xa4d   : > { %v2156_v19 = vmul.f32 1.442695, %v2149_v17  ;;  %v2147_v20 = vsub.f32 %v2083_v1, %v2139_v18  ;;  %v3030_v18 = vld [vmem:[#allocation30 + $0x8] sm:$0xff] }
 0xa4e   : > { %2380 = vmatpush.bf16.msrb.mxu0 %v3030_v18 }
 0xa4f   : > { %3362 = vpow2.f32 %v2156_v19  ;;  %v2152_v62 = vmul.f32 1.442695, %v2147_v20  ;;  %v3029_v19 = vld [vmem:[#allocation30] sm:$0xff] }
 0xa51   : > { %3364 = vpow2.f32 %v2152_v62 }
 0xa52   : > { %2381 = vmatpush.bf16.msrb.mxu0 %v3029_v19 }
 0xa54   : > { %v2142_v21 = vpop.xlane.xlu2 %2141  ;;  %v2136_v22 = vpop.xlane.xlu0 %2135 }
 0xa55   : > { %v3363_v23 = vpop.eup %3362  ;;  %v2148_v24 = vsub.f32 %v2107_v9, %v2142_v21  ;;  %v2146_v25 = vsub.f32 %v2059_v5, %v2136_v22 }
 0xa56   : > { %v2173_v26 = vpack.c.bf16 %v3363_v23, %v3363_v23  ;;  %v2167_v35 = vsel %vm1748_vm11, %v3363_v23, 0.0 }
 0xa57   : > { %v3365_v27 = vpop.eup %3364  ;;  %v2154_v28 = vmul.f32 1.442695, %v2148_v24  ;;  %v2150_v29 = vmul.f32 1.442695, %v2146_v25 }
 0xa58   : > { %v2171_v30 = vpack.c.bf16 %v3365_v27, %v3365_v27  ;;  %2952 = vmatmul.msk.bf16.vlgmr.msra.gmra.mxu2 %vm1748_vm11, %v2173_v26  ;;  %v2161_v31 = vsel %vm1748_vm11, %v3365_v27, 0.0  ;;  %v3336_v27 = vld [vmem:[%s4957_s0] ss:$0 sm:$0xff] }
 0xa59   : > { %3366 = vpow2.f32 %v2154_v28  ;;  %2162 = vadd.xlane.f32.xlu2 %v2161_v31 }
 0xa5a   : > { %3368 = vpow2.f32 %v2150_v29  ;;  %2942 = vmatmul.msk.bf16.vlgmr.msra.gmra.mxu0 %vm1748_vm11, %v2171_v30  ;;  %v3337_v30 = vld [vmem:[%s4958_s16] ss:$0 sm:$0xff] }
 0xa5f   : > { %v3367_v32 = vpop.eup %3366 }
 0xa60   : > { %v3369_v33 = vpop.eup %3368  ;;  %v2172_v34 = vpack.c.bf16 %v3367_v32, %v3367_v32  ;;  %v2164_v36 = vsel %vm1748_vm11, %v3367_v32, 0.0 }
 0xa61   : > { %v2170_v37 = vpack.c.bf16 %v3369_v33, %v3369_v33  ;;  %2168 = vadd.xlane.f32.xlu2 %v2167_v35  ;;  %2165 = vadd.xlane.f32.xlu0 %v2164_v36  ;;  %v2158_v38 = vsel %vm1748_vm11, %v3369_v33, 0.0  ;;  %v3034_v33 = vld [vmem:[%s4959_s24 + $0x18] sm:$0xff]  ;;  %v3338_v35 = vld [vmem:[#allocation32] ss:$0 sm:$0xff] }
 0xa62   : > { %2947 = vmatmul.msk.bf16.vlgmr.msra.gmra.mxu1 %vm1748_vm11, %v2172_v34  ;;  %v3033_v34 = vld [vmem:[%s4959_s24 + $0x10] sm:$0xff]  ;;  %v3032_v36 = vld [vmem:[%s4959_s24 + $0x8] sm:$0xff] }
 0xa63   : > { %2937 = vmatmul.msk.bf16.vlgmr.msrb.gmra.mxu3 %vm1748_vm11, %v2170_v37  ;;  %2452 = vmatpush.bf16.msrb.mxu1 %v3034_v33 }
 0xa67   : > { %2453 = vmatpush.bf16.msrb.mxu1 %v3033_v34 }
 0xa69   : > { %2159 = vadd.xlane.f32.xlu0 %v2158_v38 }
 0xa6b   : > { %2454 = vmatpush.bf16.msrb.mxu1 %v3032_v36 }
 0xacc   : > { %v2163_v39 = vpop.xlane.xlu2 %2162 }
 0xacd   : > { %3370 = vrcp.f32 %v2163_v39  ;;  %v3031_v39 = vld [vmem:[%s4959_s24] sm:$0xff] }
 0xace   : > { %2455 = vmatpush.bf16.msrb.mxu1 %v3031_v39 }
 0xad3   : > { %v3371_v42 = vpop.eup %3370 }
 0xad4   : > { %v2169_v40 = vpop.xlane.xlu2 %2168  ;;  %v2166_v41 = vpop.xlane.xlu0 %2165 }
 0xad5   : > { %3372 = vrcp.f32 %v2169_v40 }
 0xad6   : > { %3374 = vrcp.f32 %v2166_v41 }
 0xad7   : > { %v2214_v43 = vpop.f32.mrf.mxu0 }
 0xad8   : > { %v2267_v44 = vmul.f32 %v3371_v42, %v2214_v43 }
 0xada   : > { %2271 = vrot.lane.b32.xlu2 %v2267_v44, %s4069_s21  ;;  %s2474_s21 = sadd.s32 %s4954_s9, %s2989_s4  ;;  %s2464_s9 = scalar_lea.sflag [#allocation11], %s1210_s30 }
 0xadb   : > { %v3373_v45 = vpop.eup %3372  ;;  %v2258_v46 = vpop.f32.mrf.mxu2 }
 0xadc   : > { %v2269_v47 = vmul.f32 %v3373_v45, %v2258_v46  ;;  %v3375_v48 = vpop.eup %3374  ;;  %v2160_v60 = vpop.xlane.xlu0 %2159 }
 0xadd   : > { %3376 = vrcp.f32 %v2160_v60 }
 0xade   : > { %2279 = vrot.lane.b32.xlu0 %v2269_v47, %s4070_s20  ;;  %s2990_s20 = sshll.u32 %s2474_s21, 3 }
 0xadf   : > { %v2216_v49 = vpop.f32.mrf.mxu0  ;;  %v2236_v50 = vpop.f32.mrf.mxu1 }
 0xae0   : > { %v2268_v51 = vmul.f32 %v3375_v48, %v2236_v50 }
 0xae2   : > { %2275 = vrot.lane.b32.xlu1 %v2268_v51, %s4071_s23  ;;  %s2476_s23 = scalar_lea.hbm %s4962_s15, %s2990_s20 }
 0xae3   : > { %v2260_v52 = vpop.f32.mrf.mxu2  ;;  %v3377_v61 = vpop.eup %3376  ;;  %s2480_s1 = sshll.u32 %s2476_s23, 4  ;;  %s2481_s1 = int_to_ptr.hbm [resolvable:$true] %s2480_s1 }
 0xae4   : > { %s3872_s0 = sshra.s32 %s2481_s1, 4  ;;  %s3873_s0 = int_to_ptr.hbm [resolvable:$true] %s3872_s0 }
 0xae5   : > { %s3874_s16 = scalar_lea.hbm %s3873_s0, 8  ;;  %p3879_p2 = scmp.lt.s32.totalorder %s3873_s0, %s4963_s14 }
 0xae6   : > { %v2192_v53 = vpop.f32.mrf.mxu3  ;;  %p3875_p1 = scmp.ne.s32.totalorder %s3873_s0, %s3874_s16  ;;  %p3880_p6 = scmp.lt.s32.totalorder %s3878_s11, %s3874_s16 }
 0xae7   : > { %v2238_v54 = vpop.f32.mrf.mxu1  ;;  %v2266_v0 = vmul.f32 %v3377_v61, %v2192_v53 }
 0xae8   : > { %p3876_p5 = pnand %p3875_p1, %p4526_p9  ;;  %p3881_p7 = por %p3880_p6, %p3879_p2 }
 0xaea   : > { %p3877_p12 = pneg %p3876_p5 }
 0xaec   : > { %p3882_p8 = pnand %p3881_p7, %p3877_p12 }
 0xaee   : > { %v2194_v56 = vpop.f32.mrf.mxu3 }
 0xb34   : > { %v2272_v63 = vpop.permute.xlu2 %2271 }
 0xb35   : > { %v2282_v1 = vsel %vm1656_vm4, %v2266_v0, %v2272_v63 }
 0xb50   : > { %v2280_v3 = vpop.permute.xlu0 %2279 }
 0xb54   : > { %v2276_v2 = vpop.permute.xlu1 %2275 }
 0xb55   : > { %v2283_v4 = vsel %vm1748_vm11, %v2282_v1, %v2276_v2 }
 0xb56   : > { %v2284_v5 = vsel %vm1899_vm12, %v2283_v4, %v2280_v3 }
 0xb57   : > { %v2285_v7 = vpack.c.bf16 %v2284_v5, %v2284_v5 }
 0xb59   : > { %2961 = vmatmul.msk.bf16.vlgmr.msra.gmra.mxu3 %vm1541_vm2, %v2285_v7 }
 0xbdc   : > { %v2313_v9 = vpop.f32.mrf.mxu3 }
 0xbdd   : > { %v2314_v10 = vadd.f32 %v3335_v8, %v2313_v9 }
 0xbdf   : > { %v4774_v55 = vadd.f32 %v2314_v10, %v4730_v11 }
 0xbe1   : > { %v2320_v57 = vsel %vm1541_vm2, %v4774_v55, 0.0 }
 0xbe2   : > { %2321 = vadd.xlane.f32.xlu0 %v2320_v57 }
 0xbe4   : > { %v2315_v12 = vpop.f32.mrf.mxu3 }
 0xc55   : > { %v2322_v13 = vpop.xlane.xlu0 %2321 }
 0xc56   : > { %v2323_v14 = vmul.f32 %v2322_v13, %v4681_v6 }
 0xc58   : > { %v2324_v15 = vsub.f32 %v4774_v55, %v2323_v14 }
 0xc5a   : > { %v2325_v16 = vmul.f32 %v2324_v15, %v2324_v15 }
 0xc5c   : > { %v2326_v17 = vsel %vm1541_vm2, %v2325_v16, 0.0 }
 0xc5d   : > { %2327 = vadd.xlane.f32.xlu2 %v2326_v17 }
 0xcd0   : > { %v2328_v11 = vpop.xlane.xlu2 %2327 }
 0xcd1   : > { %v2329_v20 = vmul.f32 %v2328_v11, %v4681_v6 }
 0xcd3   : > { %v2330_v62 = vadd.f32 1e-06, %v2329_v20 }
 0xcd5   : > { %3378 = vrsqrt.f32 %v2330_v62  ;;  %vm2337_vm3 = vweird.f32 %v2330_v62 }
 0xcdb   : > { %v3379_v21 = vpop.eup %3378 }
 0xcdc   : > { %v2332_v22 = vmul.f32 %v3379_v21, %v2330_v62  ;;  %vm2338_vm1 = vweird.f32 %v3379_v21 }
 0xcdd   : > { %vm2339_vm4 = vmor %vm2337_vm3, %vm2338_vm1 }
 0xcde   : > { %v2333_v23 = vmul.f32 %v3379_v21, %v2332_v22 }
 0xce0   : > { %v2334_v24 = vmul.f32 0.5, %v2333_v23 }
 0xce2   : > { %v2335_v25 = vsub.f32 1.5, %v2334_v24 }
 0xce4   : > { %v2336_v26 = vmul.f32 %v3379_v21, %v2335_v25 }
 0xce6   : > { %v2340_v28 = vsel %vm2339_vm4, %v3379_v21, %v2336_v26 }
 0xce7   : > { %v2341_v29 = vmul.f32 %v2340_v28, %v2324_v15 }
 0xce9   : > { %v2345_v6 = vmul.f32 %v3336_v27, %v2341_v29 }
 0xceb   : > { %v2349_v31 = vadd.f32 %v3337_v30, %v2345_v6 }
 0xced   : > { %v2350_v32 = vpack.c.bf16 %v2349_v31, %v2349_v31 }
 0xcef   : > { %2970 = vmatmul.msk.bf16.vlgmr.msrb.gmra.mxu0 %vm1541_vm2, %v2350_v32 }
 0xd6c   : > { %v2383_v37 = vpop.f32.mrf.mxu0 }
 0xd6d   : > { %v2384_v38 = vadd.f32 %v3338_v35, %v2383_v37 }
 0xd6f   : > { %v2387_v40 = vsub.f32 0.0, %v2384_v38 }
 0xd71   : > { %v2388_v41 = vmul.f32 1.442695, %v2387_v40 }
 0xd73   : > { %3380 = vpow2.f32 %v2388_v41 }
 0xd74   : > { %v2385_v42 = vpop.f32.mrf.mxu0 }
 0xd79   : > { %v3381_v43 = vpop.eup %3380 }
 0xd7a   : > { %v2390_v44 = vadd.f32 1.0, %v3381_v43 }
 0xd7c   : > { %3382 = vrcp.f32 %v2390_v44  ;;  %v2402_v48 = vand.u32 2147483648, %v2390_v44  ;;  %v2400_v50 = vand.u32 2147483647, %v2390_v44  ;;  %vm2396_vm6 = vweird.f32 %v2390_v44 }
 0xd7e   : > { %v2403_v52 = vor.u32 1.1754944e-38, %v2402_v48  ;;  %vm2401_vm8 = vcmp.eq.f32.partialorder %v2400_v50, 8.507059e+37 }
 0xd82   : > { %v3383_v45 = vpop.eup %3382 }
 0xd83   : > { %v2392_v46 = vmul.f32 %v3383_v45, %v2390_v44  ;;  %vm2397_vm5 = vweird.f32 %v3383_v45 }
 0xd84   : > { %vm2398_vm7 = vmor %vm2396_vm6, %vm2397_vm5 }
 0xd85   : > { %v2393_v47 = vsub.f32 1.0, %v2392_v46 }
 0xd87   : > { %v2394_v49 = vmul.f32 %v3383_v45, %v2393_v47 }
 0xd89   : > { %v2395_v51 = vadd.f32 %v3383_v45, %v2394_v49 }
 0xd8b   : > { %v2399_v53 = vsel %vm2398_vm7, %v3383_v45, %v2395_v51 }
 0xd8c   : > { %v2404_v54 = vsel %vm2401_vm8, %v2403_v52, %v2399_v53 }
 0xd8d   : > { %v2406_v56 = vmul.f32 %v2404_v54, %v2384_v38 }
 0xd8f   : > { %v2407_v58 = vpack.c.bf16 %v2406_v56, %v2406_v56 }
 0xd91   : > { %2987 = vmatmul.msk.bf16.vlgmr.msrb.gmra.mxu1 %vm2444_vm9, %v2407_v58 }
 0xe0e   : > { %v2457_v60 = vpop.f32.mrf.mxu1 }
 0xe0f   : > { %v2458_v61 = vadd.f32 %v3339_v59, %v2457_v60 }
 0xe11   : > { %v2461_v63 = vadd.f32 %v2458_v61, %v4774_v55 }
 0xe13   : > { %2462 = vst.msk [vmem:[%s1212_s25] sm:$0xff] %vm1541_vm2, %v2461_v63 }
 0xe14   : > { %3885 = shalt.err (!%p3882_p8)
}
 0xe15   : > { %3093 = dma.vmem_to_hbm [thread:$0]  (%p4526_p9), %s2479_s19, 128, %s2481_s1, %s2464_s9  }
 0xe16   : > { %v2459_v0 = vpop.f32.mrf.mxu1 }
 0xe17 PF: > { %s4965_s25 = sld [smem:[#allocation72_spill]]  ;;  %p3175_p10 = scmp.ge.s32.totalorder %s4010_s7, 2 }
 0xe18   : > { %p4966_p3 = scmp.ne.s32.totalorder %s4935_s12, 0 }
 0xe1a   : > { %p3143_p11 = pnand %p3175_p10, %p4966_p3 }
 0xe1c   : > { %p3144_p13 = pneg %p3143_p11 }
 0xe1d   : > { %s2492_s30 = sand.u32 1, %s4965_s25  }
 0xe1e   : > { %s2493_s10 = scalar_lea.sflag [#allocation11], %s2492_s30 }
 0xe1f   : > { %3965 = dma.done.wait (%p3144_p13), %s2493_s10, 128  }
 0xe20   : > { %3967 = vsyncadd (%p3144_p13), %s2493_s10, 4294967168  ;;  %s99_s7 = sadd.s32 1, %s4010_s7   ;;  %s4967_s0 = sld [smem:[#allocation73_spill]] }
 0xe21   : > { %p96_p4 = scmp.ge.s32.totalorder %s99_s7, 6   ;;  %s4968_s28 = sld [smem:[#allocation74_spill]] }
 0xe22   : > { %s4969_s6 = smov %s4979_s17  ;;  %s4970_s9 = smov %s4985_s5 }
 0xe23   : > { %s4971_s15 = smov %s3986_s18  ;;  %s4972_s18 = smov %s3990_s13 }
 0xe24   : > { %s4973_s13 = smov %s4531_s8  ;;  %s4974_s17 = smov %s4002_s26 }
 0xe25   : > { %s4975_s22 = smov %s4006_s2  ;;  %s4976_s26 = smov %s4969_s6 }
 0xe26   : > { %s4977_s2 = smov %s4983_s3  ;;  %98 = sbr.rel (!%p96_p4) target bundleno = 101 (0x65), region = 290 }
 0xe2b   :  { %2499 = vsyncpa [#allocation10], 1 }
 0xe2c   :  { %2501 = vsyncpa [#allocation10 + $0x1], 1 }
 0xe2d   :  { %2502 = vsyncpa [#allocation13], 1 }
 0xe2e   :  { %2503 = vsyncpa [#allocation16], 1 }
 0xe2f   :  { %2504 = vsyncpa [#allocation19], 1 }
 0xe30   :  { %2505 = vsyncpa [#allocation22], 1 }
 0xe31   :  { %2506 = vsyncpa [#allocation25], 1 }
 0xe32   :  { %2507 = vsyncpa [#allocation28], 1 }
 0xe33   :  { %2508 = vsyncpa [#allocation31], 1 }
 0xe34   :  { %2509 = vsyncpa [#allocation11], 1 }
 0xe35   :  { %2511 = vsyncpa [#allocation11 + $0x1], 1 }

</bundles_post_ra>
